<compile_context>
chip_gen: v7x
topology: tpu7x:2x2x1
jax: 0.10.0
libtpu: 0.0.40
codegen_flags: <defaults>
</compile_context>

<pallas_src>
import functools

import jax
import jax.numpy as jnp
from jax import lax
from jax.experimental import pallas as pl
from jax.experimental.pallas import tpu as pltpu

_LANE = 128
_SUBLANE = 8


def _round_up(x: int, m: int) -> int:
    return ((x + m - 1) // m) * m


def _vmem_capacity_bytes() -> int:
    """Physical VMEM capacity; conservative fallback (v7x per-TC) if unknown."""
    try:
        info = pltpu.get_tpu_info()
        cap = int(getattr(info, "vmem_capacity_bytes", 0))
        if cap > 0:
            return cap
    except Exception:
        pass
    return 64 << 20


def _plan_tiles(k_pad: int, m_pad: int, x_itemsize: int, out_itemsize: int):
    """Pick (tile_n, tile_m, vmem_limit_bytes) from STATIC model dims.

    The budget counts every buffer Pallas double-buffers:
      x:   2 * tile_n * k_pad   * x_itemsize
      w:   2 * k_pad  * tile_m  * x_itemsize   (weights stored in compute dtype)
      b:   2 * 8      * tile_m  * 4            (f32 bias, sublane-padded)
      out: 2 * tile_n * tile_m  * out_itemsize
    """
    cap = _vmem_capacity_bytes()
    budget = max(8 << 20, int(cap * 0.45))

    # --- TILE_M: keep the full (lane-dense) output width unless the
    # double-buffered weight block would eat more than half the budget.
    tile_m = m_pad
    if 2 * k_pad * m_pad * x_itemsize > budget // 2:
        tile_m = _LANE
        t = _LANE
        while t <= min(m_pad, 512):
            if m_pad % t == 0 and 2 * k_pad * t * x_itemsize <= budget // 2:
                tile_m = t
            t += _LANE

    fixed = 2 * k_pad * tile_m * x_itemsize + 2 * _SUBLANE * tile_m * 4
    per_row = 2 * (k_pad * x_itemsize + tile_m * out_itemsize)
    avail = max(per_row * _SUBLANE, budget - fixed)

    tile_n = min(1024, avail // per_row)
    if tile_n >= 256:          # MXU is 256-wide on v6e/v7x, 128 on v5e
        tile_n = (tile_n // 256) * 256
    elif tile_n >= _LANE:
        tile_n = _LANE
    else:
        tile_n = max(_SUBLANE, (tile_n // _SUBLANE) * _SUBLANE)

    need = fixed + per_row * tile_n
    vmem_limit = int(min(cap, max(need * 3 // 2 + (4 << 20), 32 << 20)))
    return int(tile_n), int(tile_m), vmem_limit


def _grouped_linear_kernel(tid_ref, x_ref, w_ref, b_ref, o_ref):
    # tid_ref (scalar prefetch) is only consumed by the index_maps.
    del tid_ref
    acc = jnp.dot(x_ref[...], w_ref[...], preferred_element_type=jnp.float32)
    o_ref[...] = (acc + b_ref[...]).astype(o_ref.dtype)   # bias add in f32


@functools.partial(
    jax.jit,
    static_argnames=("tile_n", "tile_m", "out_dtype", "vmem_limit"))
def _grouped_hetero_linear(type_ids, x_all, w_all, b_all, *, tile_n, tile_m,
                           out_dtype, vmem_limit):
    rows, k_pad = x_all.shape
    _, _, m_pad = w_all.shape
    grid = (rows // tile_n, m_pad // tile_m)
    out_dt = jnp.dtype(out_dtype)

    cost = pl.CostEstimate(
        flops=2 * rows * k_pad * m_pad,
        transcendentals=0,
        bytes_accessed=(x_all.size * x_all.dtype.itemsize
                        + rows * m_pad * out_dt.itemsize
                        + w_all.size * w_all.dtype.itemsize
                        + b_all.size * b_all.dtype.itemsize),
    )

    return pl.pallas_call(
        _grouped_linear_kernel,
        out_shape=jax.ShapeDtypeStruct((rows, m_pad), out_dt),
        grid_spec=pltpu.PrefetchScalarGridSpec(
            num_scalar_prefetch=1,
            grid=grid,
            in_specs=[
                # x: row-tiled; block index constant in j -> not re-DMA'd per M tile.
                pl.BlockSpec((tile_n, k_pad), lambda i, j, tid: (i, 0)),
                # weight / bias: per-type block picked by prefetched type id;
                # leading type dim squeezed so the kernel sees 2-D refs.
                pl.BlockSpec((None, k_pad, tile_m),
                             lambda i, j, tid: (tid[i], 0, j)),
                pl.BlockSpec((None, 1, tile_m),
                             lambda i, j, tid: (tid[i], 0, j)),
            ],
            out_specs=pl.BlockSpec((tile_n, tile_m),
                                   lambda i, j, tid: (i, j)),
        ),
        compiler_params=pltpu.CompilerParams(
            # Row tiles shard across TensorCores; M tiles iterate in-core so
            # the x block is reused across them.
            dimension_semantics=("parallel", "arbitrary"),
            vmem_limit_bytes=vmem_limit,
        ),
        cost_estimate=cost,
    )(type_ids, x_all, w_all, b_all)


class HeteroLinearPallas:
    """JAX/Pallas equivalent of the PyTorch HeteroLinear module:
    h[k] = x[k] @ W[k].T + b[k] for every node type k."""

    def __init__(self, in_feats: dict, out_dim: int, key: jax.Array,
                 dtype=jnp.float32, compute_dtype=None):
        self.in_feats = {k: int(v) for k, v in in_feats.items()}
        self.out_dim = int(out_dim)
        self.dtype = jnp.dtype(dtype)
        self.compute_dtype = (jnp.dtype(compute_dtype)
                              if compute_dtype is not None else self.dtype)
        self._m_pad = _round_up(self.out_dim, _LANE)
        self.params = {}

        # Bucket node types by lane-aligned input width so heterogeneous
        # feature dims never pad K to a global max.
        bucket_names = {}
        for name, v in self.in_feats.items():
            kp = _round_up(v, _LANE)
            bucket_names.setdefault(kp, []).append(name)

        x_item = self.compute_dtype.itemsize
        out_item = self.dtype.itemsize
        self._type_kpad = {}
        self._buckets = {}
        for kp, names in bucket_names.items():
            n_types = len(names)
            w_all = jnp.zeros((n_types, kp, self._m_pad), self.compute_dtype)
            b_all = jnp.zeros((n_types, 1, self._m_pad), jnp.float32)
            index = {}
            for i, name in enumerate(names):
                v = self.in_feats[name]
                key, wk, bk = jax.random.split(key, 3)
                bound = 1.0 / (v ** 0.5)          # nn.Linear default init
                w = jax.random.uniform(wk, (self.out_dim, v), jnp.float32,
                                       -bound, bound)
                b = jax.random.uniform(bk, (self.out_dim,), jnp.float32,
                                       -bound, bound)
                self.params[name] = (w, b)        # kept for reference checks
                # Pre-transpose + zero-pad + cast ONCE at init.
                w_all = w_all.at[i, :v, :self.out_dim].set(
                    w.T.astype(self.compute_dtype))
                b_all = b_all.at[i, 0, :self.out_dim].set(b)
                index[name] = i
                self._type_kpad[name] = kp
            tile_n, tile_m, vmem_limit = _plan_tiles(kp, self._m_pad,
                                                     x_item, out_item)
            self._buckets[kp] = dict(w_all=w_all, b_all=b_all, index=index,
                                     tile_n=tile_n, tile_m=tile_m,
                                     vmem_limit=vmem_limit)

    def __call__(self, inputs: dict):
        # Group present inputs by their K bucket (one fused launch per bucket).
        by_bucket = {}
        for name in inputs:
            assert name in self._type_kpad, f"unknown node type {name!r}"
            by_bucket.setdefault(self._type_kpad[name], []).append(name)

        outputs = {}
        for kp, names in by_bucket.items():
            bucket = self._buckets[kp]
            tile_n = bucket["tile_n"]

            # Layout: each type's rows padded to a multiple of the (static)
            # row tile; per-tile type ids drive the weight index_map.
            spans, tids, total = [], [], 0
            for name in names:
                x = inputs[name]
                n, d = x.shape
                assert d == self.in_feats[name], (
                    f"feature dim mismatch for {name!r}: got {d}, "
                    f"expected {self.in_feats[name]}")
                n_pad = _round_up(max(n, 1), tile_n)
                spans.append((name, total, n))
                tids.extend([bucket["index"][name]] * (n_pad // tile_n))
                total += n_pad

            # Single preallocated slab + in-place row writes (no pad+concat).
            x_all = jnp.zeros((total, kp), self.compute_dtype)
            for name, off, n in spans:
                if n == 0:
                    continue
                x_all = lax.dynamic_update_slice(
                    x_all, inputs[name].astype(self.compute_dtype), (off, 0))
            tid = jnp.asarray(tids, dtype=jnp.int32)

            out = _grouped_hetero_linear(
                tid, x_all, bucket["w_all"], bucket["b_all"],
                tile_n=tile_n, tile_m=bucket["tile_m"],
                out_dtype=self.dtype.name, vmem_limit=bucket["vmem_limit"])

            for name, off, n in spans:
                outputs[name] = out[off:off + n, :self.out_dim]

        return {k: outputs[k] for k in inputs}   # preserve input order


if __name__ == "__main__":
    key = jax.random.PRNGKey(0)

    # Small, module-consistent shapes: two node types with different in-dims.
    in_feats = {"user": 32, "item": 16}
    out_dim = 64
    n_nodes = {"user": 8, "item": 8}

    key, kparam, ku, ki = jax.random.split(key, 4)
    model = HeteroLinearPallas(in_feats, out_dim, kparam)

    inputs = {
        "user": jax.random.normal(ku, (n_nodes["user"], in_feats["user"]),
                                  jnp.float32),
        "item": jax.random.normal(ki, (n_nodes["item"], in_feats["item"]),
                                  jnp.float32),
    }

    out = model(inputs)
    out = jax.tree_util.tree_map(jax.block_until_ready, out)

    # Reference check against plain JAX (x @ W.T + b).
    ok = True
    for k, x in inputs.items():
        w, b = model.params[k]
        ref = jnp.dot(x, w.T, precision=jax.lax.Precision.HIGHEST) + b
        ok &= bool(jnp.allclose(out[k], ref, atol=1e-3, rtol=1e-3))
        assert out[k].shape == (n_nodes[k], out_dim)

    if ok:
        print("KERNEL_OK")
    else:
        raise AssertionError("mismatch vs. reference")
</pallas_src>

<mosaic_0001>
module attributes {stable_mosaic.version = 11 : i64} {
  func.func @_grouped_linear_kernel(%arg0: i32, %arg1: i32, %arg2: memref<2xi32, #tpu.memory_space<smem>>, %arg3: memref<1024x128xf32, #tpu.memory_space<vmem>>, %arg4: memref<1x128x128xf32, #tpu.memory_space<vmem>>, %arg5: memref<1x1x128xf32, #tpu.memory_space<vmem>>, %arg6: memref<1024x128xf32, #tpu.memory_space<vmem>>) attributes {dimension_semantics = [#tpu.dimension_semantics<parallel>, #tpu.dimension_semantics<arbitrary>], iteration_bounds = array<i64: 2, 1>, scalar_prefetch = 1 : i64, scratch_operands = 0 : i64, tpu.core_type = #tpu.core_type<tc>, window_params = [{transform_indices = @transform_0, window_bounds = array<i64: 1024, 128>}, {transform_indices = @transform_1, window_bounds = array<i64: 1, 128, 128>}, {transform_indices = @transform_2, window_bounds = array<i64: 1, 1, 128>}, {transform_indices = @transform_3, window_bounds = array<i64: 1024, 128>}]} {
    %c0 = arith.constant 0 : index
    %c0_0 = arith.constant 0 : index
    %0 = vector.load %arg3[%c0, %c0_0] : memref<1024x128xf32, #tpu.memory_space<vmem>>, vector<1024x128xf32>
    %c0_1 = arith.constant 0 : index
    %c0_2 = arith.constant 0 : index
    %c0_3 = arith.constant 0 : index
    %1 = vector.load %arg4[%c0_1, %c0_2, %c0_3] : memref<1x128x128xf32, #tpu.memory_space<vmem>>, vector<1x128x128xf32>
    %2 = vector.shape_cast %1 : vector<1x128x128xf32> to vector<128x128xf32>
    %cst = arith.constant dense<0.000000e+00> : vector<1024x128xf32>
    %3 = tpu.matmul %0, %2, %cst {dimension_numbers = #tpu.dot_dimension_numbers<[1], [0], [0], [1], [0, 0, 1, 1], [], []>} : vector<1024x128xf32>, vector<128x128xf32>, vector<1024x128xf32> -> vector<1024x128xf32>
    %c0_4 = arith.constant 0 : index
    %c0_5 = arith.constant 0 : index
    %c0_6 = arith.constant 0 : index
    %4 = vector.load %arg5[%c0_4, %c0_5, %c0_6] : memref<1x1x128xf32, #tpu.memory_space<vmem>>, vector<1x1x128xf32>
    %5 = vector.shape_cast %4 : vector<1x1x128xf32> to vector<1x128xf32>
    %6 = vector.broadcast %5 : vector<1x128xf32> to vector<1024x128xf32>
    %7 = arith.addf %3, %6 : vector<1024x128xf32>
    %c0_7 = arith.constant 0 : index
    %c0_8 = arith.constant 0 : index
    %8 = vector.load %arg6[%c0_7, %c0_8] : memref<1024x128xf32, #tpu.memory_space<vmem>>, vector<1024x128xf32>
    tpu.vector_store %arg6[%c0_7, %c0_8], %7 {strides = array<i32>} : memref<1024x128xf32, #tpu.memory_space<vmem>>, vector<1024x128xf32>,
    return
  }
  func.func @transform_0(%arg0: i32, %arg1: i32, %arg2: memref<2xi32, #tpu.memory_space<smem>>) -> (i32, i32) {
    %c0_i32 = arith.constant 0 : i32
    %c0_i32_0 = arith.constant 0 : i32
    return %arg0, %c0_i32 : i32, i32
  }
  func.func @transform_1(%arg0: i32, %arg1: i32, %arg2: memref<2xi32, #tpu.memory_space<smem>>) -> (i32, i32, i32) {
    %0 = arith.index_cast %arg0 : i32 to index
    %1 = memref.load %arg2[%0] : memref<2xi32, #tpu.memory_space<smem>>
    %c0_i32 = arith.constant 0 : i32
    %c0_i32_0 = arith.constant 0 : i32
    return %1, %c0_i32, %arg1 : i32, i32, i32
  }
  func.func @transform_2(%arg0: i32, %arg1: i32, %arg2: memref<2xi32, #tpu.memory_space<smem>>) -> (i32, i32, i32) {
    %0 = arith.index_cast %arg0 : i32 to index
    %1 = memref.load %arg2[%0] : memref<2xi32, #tpu.memory_space<smem>>
    %c0_i32 = arith.constant 0 : i32
    %c0_i32_0 = arith.constant 0 : i32
    return %1, %c0_i32, %arg1 : i32, i32, i32
  }
  func.func @transform_3(%arg0: i32, %arg1: i32, %arg2: memref<2xi32, #tpu.memory_space<smem>>) -> (i32, i32) {
    %c0_i32 = arith.constant 0 : i32
    return %arg0, %arg1 : i32, i32
  }
}

</mosaic_0001>

<bundles_post_ra>
// kernel: _grouped_hetero_linear.1
= control target key start
LH: loop header
LB: loop body
LE: loop exit
PB: predicated region body
PF: predicated region fallthrough
CT: control target
= control target key end

     0   :  { %s2902_s0 = inlined_call_operand.hbm [shape: s32[2], index: 0, kind: input, shape index: {}]   ;;  %s2903_s1 = inlined_call_operand.hbm [shape: f32[2048,128], index: 1, kind: input, shape index: {}]   ;;  %s2904_s2 = inlined_call_operand.hbm [shape: f32[2,128,128], index: 2, kind: input, shape index: {}]   ;;  %s2905_s3 = inlined_call_operand.vmem [shape: f32[2,1,128], index: 3, kind: input, shape index: {}]   ;;  %s2906_s4 = inlined_call_operand.hbm [shape: f32[2048,128], index: 4, kind: output, shape index: {}]  }
   0x1   :  { %2916 = sst [smem:[#allocation18_spill]] %s2903_s1  ;;  %s1947_s17 = scalar_lea.hbm %s2902_s0, 16 }
   0x2   :  { %p1948_p0 = scmp.ne.s32.totalorder %s2902_s0, %s1947_s17  ;;  %p1951_p1 = scmp.lt.u32.totalorder %s1947_s17, %s2902_s0 }
   0x4   :  { %p1953_p2 = pnand %p1951_p1, %p1948_p0 }
   0x6   :  { %1956 = shalt.err (!%p1953_p2)  }
   0x7   :  { %s2131_s22 = smov [#allocation3]  }
   0x8   :  { %10 = dma.hbm_to_smem %s2902_s0, 16, %s2131_s22, [#allocation2] }
   0x9   :  { %2081 = dma.done.wait [#allocation2], 16 }
   0xa   :  { %2082 = vsyncadd [#allocation2], 4294967280 }
   0xb   :  { %12 = sfence }
   0xc   :  { %13 = vsyncpa [#allocation5], 0 }
   0xd   :  { %15 = vsyncpa [#allocation5 + $0x1], 0 }
   0xe   :  { %16 = vsyncpa [#allocation8], 0 }
   0xf   :  { %18 = vsyncpa [#allocation8 + $0x1], 0 }
  0x10   :  { %19 = vsyncpa [#allocation6], 0 }
  0x11   :  { %21 = vsyncpa [#allocation6 + $0x1], 0  ;;  %s2176_s25 = smov 0   ;;  %s2178_s26 = smov 0  }
  0x12   :  { %s2180_s27 = smov 0   ;;  %s2182_s28 = smov 0  }
  0x13   :  { %s2184_s29 = smov 0   ;;  %s2186_s0 = smov 0  }
  0x14   :  { %s2188_s30 = smov 0   ;;  %s2190_s5 = smov 0  }
  0x15   :  { %s2192_s6 = smov 0  }
  0x16 LB: > { %2917 = sst [smem:[#allocation16_spill]] %s2125_s5  ;;  %s1408_s7 = sadd.s32 4294967295, %s2129_s6   ;;  %s2129_s6 = sphi %s2192_s6, %s27_s6   ;;  %s2125_s5 = sphi %s2190_s5, %s2942_s5   ;;  %s2121_s30 = sphi %s2188_s30, %s2941_s30   ;;  %s2117_s0 = sphi %s2186_s0, %s2948_s0   ;;  %s2113_s29 = sphi %s2184_s29, %s2947_s29   ;;  %s2109_s28 = sphi %s2182_s28, %s2946_s28   ;;  %s2105_s27 = sphi %s2180_s27, %s2945_s27   ;;  %s2101_s26 = sphi %s2178_s26, %s2944_s26   ;;  %s2097_s25 = sphi %s2176_s25, %s2943_s25  }
  0x17   : > { %s1409_s8 = sadd.s32 4294967294, %s2129_s6   ;;  %s39_s9 = sadd.s32 1, %s2125_s5 }
  0x18   : > { %s46_s10 = sadd.s32 1, %s2117_s0  ;;  %p41_p3 = scmp.ge.s32.totalorder %s39_s9, 2 }
  0x19   : > { %p53_p4 = scmp.ne.s32.totalorder %s2117_s0, %s2113_s29  ;;  %p2909_p5 = scmp.eq.s32.totalorder %s2129_s6, 0 }
  0x1a   : > { %p59_p6 = scmp.ne.s32.totalorder %s2113_s29, %s2109_s28  ;;  %s2950_s9 = smov (%p41_p3, %s39_s9), 0 }
  0x1b   : > { %2918 = sst [smem:[#allocation17_spill]] %s2950_s9  ;;  %p2237_p7 = por %p2909_p5, %p53_p4 }
  0x1c   : > { %p2241_p8 = scmp.eq.s32.totalorder %s1408_s7, 0  ;;  %s43_s13 = ssub.s32 %s2125_s5, %s2950_s9 }
  0x1d   : > { %s2248_s14 = sld [smem:[#allocation3 + %s2125_s5]]  ;;  %p44_p9 = scmp.eq.s32.totalorder %s43_s13, 0 }
  0x1e   : > { %p2255_p10 = por %p2241_p8, %p59_p6  ;;  %s2260_s16 = sld [smem:[#allocation3 + %s2950_s9]] }
  0x1f   : > { %p145_p11 = scmp.eq.s32.totalorder %s1408_s7, 1  ;;  %p151_p13 = scmp.eq.s32.totalorder %s1409_s8, 1 }
  0x20   : > { %s2921_s15 = scalar_select %p2255_p10, 1, 0 }
  0x21   : > { %s2263_s17 = scalar_select %p44_p9, %s2117_s0, %s46_s10  }
  0x22   : > { %p2268_p12 = por %p145_p11, %p53_p4  ;;  %p2908_p1 = scmp.lt.s32.totalorder %s2129_s6, 2 }
  0x23   : > { %p2277_p2 = por %p151_p13, %p59_p6  ;;  %s171_s20 = sand.u32 1, %s2117_s0  }
  0x24   : > { %s2922_s18 = scalar_select %p2268_p12, 1, 0 }
  0x25   : > { %s2923_s19 = scalar_select %p2277_p2, 1, 0 }
  0x26   : > { %s1412_s21 = sshll.u32 %s171_s20, 10  ;;  %s1428_s22 = sshll.u32 %s2125_s5, 14 }
  0x27   : > { %s2924_s1 = sld [smem:[#allocation18_spill]]  ;;  %s175_s8 = scalar_lea.vmem [#allocation4], %s1412_s21 }
  0x28   : > { %s182_s10 = sshll.u32 %s175_s8, 4  ;;  %p2294_p3 = pnand %p2908_p1, %p2237_p7  ;;  %s2288_s10 = int_to_ptr.vmem [resolvable:$true] %s182_s10 }
  0x29   : > { %s2299_s23 = scalar_lea.sflag [#allocation5], %s171_s20 }
  0x2a   : > { %p1959_p9 = pneg %p2294_p3 }
  0x2d   : > { %s2286_s7 = scalar_lea.hbm %s2924_s1, %s1428_s22  ;;  %s1962_s24 = scalar_lea.hbm %s2924_s1, 32768 }
  0x2e   : > { %s1957_s22 = scalar_lea.hbm %s2286_s7, 16384  ;;  %p1963_p7 = scmp.lt.u32.totalorder %s2286_s7, %s2924_s1 }
  0x2f   : > { %p1958_p6 = scmp.ne.s32.totalorder %s2286_s7, %s1957_s22  ;;  %p1964_p0 = scmp.lt.u32.totalorder %s1962_s24, %s1957_s22 }
  0x30   : > { %p1966_p5 = scmp.lt.u32.totalorder %s1957_s22, %s2286_s7 }
  0x31   : > { %p1960_p11 = pnand %p1959_p9, %p1958_p6  ;;  %p1965_p1 = por %p1964_p0, %p1963_p7 }
  0x33   : > { %p1961_p13 = pneg %p1960_p11  ;;  %p1967_p4 = por %p1966_p5, %p1965_p1 }
  0x35   : > { %p1968_p2 = pnand %p1967_p4, %p1961_p13 }
  0x37   : > { %1971 = shalt.err (!%p1968_p2)
}
  0x38   : > { %s1972_s20 = scalar_lea.vmem %s2288_s10, 16384  ;;  %s2132_s21 = smov [#allocation4]  }
  0x39   : > { %p1973_p6 = scmp.ne.s32.totalorder %s2288_s10, %s1972_s20  ;;  %s1977_s11 = sshll.u32 %s2132_s21, 4  ;;  %s1978_s11 = int_to_ptr.vmem [resolvable:$false] %s1977_s11 }
  0x3a   : > { %s1979_s9 = scalar_lea.vmem %s1978_s11, 32768  ;;  %p1980_p10 = scmp.lt.s32.totalorder %s2288_s10, %s1978_s11 }
  0x3b   : > { %p1975_p11 = pnand %p1973_p6, %p1959_p9  ;;  %p1981_p0 = scmp.lt.s32.totalorder %s1979_s9, %s1972_s20 }
  0x3d   : > { %p1976_p12 = pneg %p1975_p11  ;;  %p1982_p7 = por %p1981_p0, %p1980_p10 }
  0x3f   : > { %p1983_p5 = pnand %p1982_p7, %p1976_p12 }
  0x41   : > { %1986 = shalt.err (!%p1983_p5)
}
  0x42   : > { %s2912_s22 = smov 128   ;;  %s2913_s24 = smov 8  }
  0x43   : > { %1858 = dma.hbm_to_vmem [thread:$0]  (!%p2294_p3), %s2286_s7, 16384, %s2288_s10, %s2299_s23, %s2912_s22, %s2912_s22, %s2913_s24  }
  0x44   : > { %p224_p10 = scmp.lt.s32.totalorder %s2129_s6, 3  ;;  %p2926_p12 = scmp.ge.s32.totalorder %s2129_s6, 1 }
  0x45   : > { %s71_s20 = ssub.s32 %s2248_s14, %s2260_s16  ;;  %s76_s21 = sadd.s32 1, %s2105_s27 }
  0x46   : > { %p2333_p1 = pnand %p2926_p12, %p224_p10  ;;  %p74_p2 = scmp.eq.s32.totalorder %s71_s20, 0 }
  0x47   : > { %p83_p4 = scmp.ne.s32.totalorder %s2105_s27, %s2101_s26  ;;  %p89_p9 = scmp.ne.s32.totalorder %s2101_s26, %s2097_s25 }
  0x48   : > { %s192_s11 = sand.u32 1, %s2105_s27   ;;  %p2928_p13 = scmp.eq.s32.totalorder %s2129_s6, 0 }
  0x49   : > { %s2346_s13 = scalar_select %p74_p2, %s2105_s27, %s76_s21  }
  0x4a   : > { %p85_p6 = por %p83_p4, %p2928_p13  ;;  %p2352_p3 = por %p89_p9, %p2241_p8 }
  0x4b   : > { %s1415_s10 = sshll.u32 %s192_s11, 7  ;;  %p2930_p11 = scmp.lt.s32.totalorder %s2129_s6, 2 }
  0x4c   : > { %s2929_s7 = scalar_select %p2352_p3, 1, 0 }
  0x4d   : > { %p2358_p0 = pnand %p2930_p11, %p85_p6  ;;  %p2932_p7 = pmov %p2930_p11 }
  0x4e   : > { %s1848_s14 = scalar_select %p85_p6, [#allocation3], [#allocation10] }
  0x4f   : > { %s1849_s25 = scalar_select %p85_p6, %s2125_s5, 0 }
  0x50   : > { %s2952_s14 = smov (!%p2932_p7, %s1848_s14), [#allocation11]  ;;  %p2933_p5 = pmov %p2932_p7 }
  0x51   : > { %s196_s12 = scalar_lea.vmem [#allocation7], %s1415_s10  ;;  %s2374_s1 = scalar_lea.sflag [#allocation8], %s192_s11 }
  0x52   : > { %s2954_s25 = smov (!%p2933_p5, %s1849_s25), 0  ;;  %s205_s9 = sshll.u32 %s196_s12, 4  ;;  %s2367_s9 = int_to_ptr.vmem [resolvable:$true] %s205_s9 }
  0x53   : > { %s197_s16 = sld [smem:[%s2952_s14 + %s2954_s25]]  ;;  %p1989_p10 = pneg %p2358_p0 }
  0x54   : > { %s1992_s22 = scalar_lea.hbm %s2904_s2, 4096 }
  0x59   : > { %s1429_s20 = sshll.u32 %s197_s16, 11 }
  0x5a   : > { %s2372_s24 = scalar_lea.hbm %s2904_s2, %s1429_s20 }
  0x5b   : > { %s1987_s5 = scalar_lea.hbm %s2372_s24, 2048  ;;  %p1993_p4 = scmp.lt.u32.totalorder %s2372_s24, %s2904_s2 }
  0x5c   : > { %p1988_p8 = scmp.ne.s32.totalorder %s2372_s24, %s1987_s5  ;;  %p1994_p9 = scmp.lt.u32.totalorder %s1992_s22, %s1987_s5 }
  0x5d   : > { %p1996_p6 = scmp.lt.u32.totalorder %s1987_s5, %s2372_s24 }
  0x5e   : > { %p1990_p12 = pnand %p1989_p10, %p1988_p8  ;;  %p1995_p13 = por %p1994_p9, %p1993_p4 }
  0x60   : > { %p1991_p2 = pneg %p1990_p12  ;;  %p1997_p11 = por %p1996_p6, %p1995_p13 }
  0x62   : > { %p1998_p7 = pnand %p1997_p11, %p1991_p2 }
  0x64   : > { %2001 = shalt.err (!%p1998_p7)
}
  0x65   : > { %s2002_s11 = scalar_lea.vmem %s2367_s9, 2048  ;;  %s2135_s12 = smov [#allocation7]  }
  0x66   : > { %p2003_p5 = scmp.ne.s32.totalorder %s2367_s9, %s2002_s11  ;;  %s2007_s20 = sshll.u32 %s2135_s12, 4  ;;  %s2008_s20 = int_to_ptr.vmem [resolvable:$false] %s2007_s20 }
  0x67   : > { %s2009_s21 = scalar_lea.vmem %s2008_s20, 4096  ;;  %p2010_p3 = scmp.lt.s32.totalorder %s2367_s9, %s2008_s20 }
  0x68   : > { %p2005_p8 = pnand %p2003_p5, %p1989_p10  ;;  %p2011_p4 = scmp.lt.s32.totalorder %s2009_s21, %s2002_s11 }
  0x6a   : > { %p2006_p12 = pneg %p2005_p8  ;;  %p2012_p9 = por %p2011_p4, %p2010_p3 }
  0x6c   : > { %p2013_p13 = pnand %p2012_p9, %p2006_p12 }
  0x6e   : > { %2016 = shalt.err (!%p2013_p13)
}
  0x6f   : > { %s2934_s5 = smov 8   ;;  %s2935_s10 = smov 128  }
  0x70   : > { %1863 = dma.hbm_to_vmem [thread:$0]  (!%p2358_p0), %s2372_s24, 2048, %s2367_s9, %s2374_s1, %s2935_s10, %s2935_s10, %s2934_s5  }
  0x71   : > { %228 = sbr.rel (%p2333_p1) target bundleno = 514 (0x202), region = 32  ;;  %s2408_s14 = sand.u32 (!%p2333_p1), 1, %s2113_s29  }
  0x72   : > { %s1419_s22 = sshll.u32 (!%p2333_p1), %s2408_s14, 10  ;;  %s231_s25 = scalar_lea.sflag (!%p2333_p1), [#allocation5], %s2408_s14 }
  0x73   : > { %s2414_s23 = scalar_lea.vmem (!%p2333_p1), [#allocation4], %s1419_s22  ;;  %p2936_p3 = scmp.ne.s32.totalorder (!%p2333_p1), %s2921_s15, 0 }
  0x78   : > { %2084 = dma.done.wait (%p2936_p3), %s231_s25, 16384  }
  0x79   : > { %2086 = vsyncadd (%p2936_p3), %s231_s25, 4294950912  ;;  %s239_s1 = sand.u32 1, %s2101_s26   ;;  %p2937_p1 = scmp.ne.s32.totalorder %s2929_s7, 0 }
  0x7a   : > { %s1420_s24 = sshll.u32 %s239_s1, 7  ;;  %s240_s8 = scalar_lea.sflag [#allocation8], %s239_s1 }
  0x7b   : > { %s2421_s9 = scalar_lea.vmem [#allocation7], %s1420_s24 }
  0x7c   : > { %2088 = dma.done.wait (%p2937_p1), %s240_s8, 2048  }
  0x7d   : > { %2090 = vsyncadd (%p2937_p1), %s240_s8, 4294965248  ;;  %v417_v0 = vld [vmem:[%s2421_s9] sm:$0xff]  ;;  %v418_v1 = vld [vmem:[%s2421_s9 + $0x8] sm:$0xff]  ;;  %s280_s15 = sld [smem:[#allocation3 + %s2121_s30]]  ;;  %s2583_s12 = scalar_lea.vmem [#allocation9], %s1419_s22 }
  0x7e   : > { %v419_v2 = vld [vmem:[%s2421_s9 + $0x10] sm:$0xff]  ;;  %v1799_v3 = vpack.c.bf16 %v418_v1, %v417_v0  ;;  %v420_v4 = vld [vmem:[%s2421_s9 + $0x18] sm:$0xff]  ;;  %v421_v6 = vld [vmem:[%s2421_s9 + $0x20] sm:$0xff]  ;;  %s1430_s20 = sshll.u32 %s2121_s30, 14  ;;  %s1288_s21 = sshll.u32 %s2583_s12, 4  ;;  %s2838_s21 = int_to_ptr.vmem [resolvable:$true] %s1288_s21 }
  0x7f   : > { %v1803_v5 = vpack.c.bf16 %v420_v4, %v419_v2  ;;  %v422_v7 = vld [vmem:[%s2421_s9 + $0x28] sm:$0xff]  ;;  %v289_v9 = vld [vmem:[%s2414_s23] sm:$0xff]  ;;  %v423_v11 = vld [vmem:[%s2421_s9 + $0x30] sm:$0xff]  ;;  %s2836_s10 = scalar_lea.hbm %s2906_s4, %s1430_s20  ;;  %s1274_s22 = scalar_lea.sflag [#allocation6], %s2408_s14 }
  0x80   : > { %1800 = vmatprep.subr.bf16.mxu0 %v1799_v3  ;;  %1831 = vmatprep.subr.bf16.mxu1 %v1799_v3  ;;  %v1807_v8 = vpack.c.bf16 %v422_v7, %v421_v6  ;;  %v353_v10 = vld [vmem:[%s2414_s23 + $0x200] sm:$0xff]  ;;  %v424_v12 = vld [vmem:[%s2421_s9 + $0x38] sm:$0xff]  ;;  %v426_v15 = vld [vmem:[%s2421_s9 + $0x48] sm:$0xff]  ;;  %s2017_s25 = scalar_lea.vmem %s2838_s21, 16384  ;;  %p2938_p2 = scmp.ne.s32.totalorder %s2922_s18, 0 }
  0x81   : > { %1802 = vmatpush3.bf16.msra.mxu0 %v1799_v3  ;;  %1839 = vmatpush3.bf16.msra.mxu1 %v1799_v3  ;;  %v1811_v13 = vpack.c.bf16 %v424_v12, %v423_v11  ;;  %v425_v14 = vld [vmem:[%s2421_s9 + $0x40] sm:$0xff]  ;;  %v427_v17 = vld [vmem:[%s2421_s9 + $0x50] sm:$0xff]  ;;  %v428_v18 = vld [vmem:[%s2421_s9 + $0x58] sm:$0xff]  ;;  %p2018_p10 = scmp.ne.s32.totalorder %s2838_s21, %s2017_s25 }
  0x82   : > { %1804 = vmatprep.subr.bf16.mxu0 %v1803_v5  ;;  %1832 = vmatprep.subr.bf16.mxu1 %v1803_v5  ;;  %v1815_v16 = vpack.c.bf16 %v426_v15, %v425_v14  ;;  %v1819_v19 = vpack.c.bf16 %v428_v18, %v427_v17  ;;  %v429_v20 = vld [vmem:[%s2421_s9 + $0x60] sm:$0xff]  ;;  %v430_v21 = vld [vmem:[%s2421_s9 + $0x68] sm:$0xff]  ;;  %v431_v23 = vld [vmem:[%s2421_s9 + $0x70] sm:$0xff] }
  0x83   : > { %1607 = vmatprep.mubr.f32.mxu0 %v289_v9  ;;  %1703 = vmatprep.mubr.f32.mxu1 %v353_v10  ;;  %v1823_v22 = vpack.c.bf16 %v430_v21, %v429_v20  ;;  %v432_v24 = vld [vmem:[%s2421_s9 + $0x78] sm:$0xff]  ;;  %v290_v26 = vld [vmem:[%s2414_s23 + $0x8] sm:$0xff]  ;;  %v291_v28 = vld [vmem:[%s2414_s23 + $0x10] sm:$0xff]  ;;  %p281_p0 = scmp.lt.s32.totalorder %s280_s15, 1  ;;  %p2019_p6 = pnand %p2018_p10, %p2938_p2 }
  0x84   : > { %v1827_v25 = vpack.c.bf16 %v432_v24, %v431_v23  ;;  %v354_v27 = vld [vmem:[%s2414_s23 + $0x208] sm:$0xff]  ;;  %v355_v29 = vld [vmem:[%s2414_s23 + $0x210] sm:$0xff]  ;;  %v292_v30 = vld [vmem:[%s2414_s23 + $0x18] sm:$0xff] }
  0x85   : > { %1806 = vmatpush3.bf16.msra.mxu0 %v1803_v5  ;;  %1840 = vmatpush3.bf16.msra.mxu1 %v1803_v5  ;;  %v356_v31 = vld [vmem:[%s2414_s23 + $0x218] sm:$0xff]  ;;  %v293_v32 = vld [vmem:[%s2414_s23 + $0x20] sm:$0xff]  ;;  %v294_v34 = vld [vmem:[%s2414_s23 + $0x28] sm:$0xff]  ;;  %s2956_s15 = smov (!%p281_p0, %s280_s15), 1  ;;  %p2020_p11 = pneg %p2019_p6 }
  0x86   : > { %1808 = vmatprep.subr.bf16.mxu0 %v1807_v8  ;;  %1833 = vmatprep.subr.bf16.mxu1 %v1807_v8  ;;  %v357_v33 = vld [vmem:[%s2414_s23 + $0x220] sm:$0xff]  ;;  %v358_v35 = vld [vmem:[%s2414_s23 + $0x228] sm:$0xff]  ;;  %v295_v36 = vld [vmem:[%s2414_s23 + $0x30] sm:$0xff]  ;;  %s286_s11 = scalar_lea.vmem %s2905_s3, %s2956_s15 }
  0x87   : > { %v359_v37 = vld [vmem:[%s2414_s23 + $0x230] sm:$0xff]  ;;  %v296_v38 = vld [vmem:[%s2414_s23 + $0x38] sm:$0xff]  ;;  %v297_v40 = vld [vmem:[%s2414_s23 + $0x40] sm:$0xff] }
  0x88   : > { %v360_v39 = vld [vmem:[%s2414_s23 + $0x238] sm:$0xff]  ;;  %v361_v41 = vld [vmem:[%s2414_s23 + $0x240] sm:$0xff]  ;;  %v298_v42 = vld [vmem:[%s2414_s23 + $0x48] sm:$0xff] }
  0x89   : > { %1810 = vmatpush3.bf16.msra.mxu0 %v1807_v8  ;;  %1841 = vmatpush3.bf16.msra.mxu1 %v1807_v8  ;;  %v362_v43 = vld [vmem:[%s2414_s23 + $0x248] sm:$0xff]  ;;  %v299_v44 = vld [vmem:[%s2414_s23 + $0x50] sm:$0xff]  ;;  %v300_v46 = vld [vmem:[%s2414_s23 + $0x58] sm:$0xff] }
  0x8a   : > { %1812 = vmatprep.subr.bf16.mxu0 %v1811_v13  ;;  %1834 = vmatprep.subr.bf16.mxu1 %v1811_v13  ;;  %v363_v45 = vld [vmem:[%s2414_s23 + $0x250] sm:$0xff]  ;;  %v364_v47 = vld [vmem:[%s2414_s23 + $0x258] sm:$0xff]  ;;  %v301_v48 = vld [vmem:[%s2414_s23 + $0x60] sm:$0xff] }
  0x8b   : > { %v365_v49 = vld [vmem:[%s2414_s23 + $0x260] sm:$0xff]  ;;  %v302_v50 = vld [vmem:[%s2414_s23 + $0x68] sm:$0xff]  ;;  %v303_v52 = vld [vmem:[%s2414_s23 + $0x70] sm:$0xff] }
  0x8c   : > { %v366_v51 = vld [vmem:[%s2414_s23 + $0x268] sm:$0xff]  ;;  %v367_v53 = vld [vmem:[%s2414_s23 + $0x270] sm:$0xff]  ;;  %v304_v54 = vld [vmem:[%s2414_s23 + $0x78] sm:$0xff] }
  0x8d   : > { %1814 = vmatpush3.bf16.msra.mxu0 %v1811_v13  ;;  %1842 = vmatpush3.bf16.msra.mxu1 %v1811_v13  ;;  %v368_v55 = vld [vmem:[%s2414_s23 + $0x278] sm:$0xff]  ;;  %v305_v56 = vld [vmem:[%s2414_s23 + $0x80] sm:$0xff]  ;;  %v306_v58 = vld [vmem:[%s2414_s23 + $0x88] sm:$0xff] }
  0x8e   : > { %1816 = vmatprep.subr.bf16.mxu0 %v1815_v16  ;;  %1835 = vmatprep.subr.bf16.mxu1 %v1815_v16  ;;  %v369_v57 = vld [vmem:[%s2414_s23 + $0x280] sm:$0xff]  ;;  %v370_v59 = vld [vmem:[%s2414_s23 + $0x288] sm:$0xff]  ;;  %v307_v60 = vld [vmem:[%s2414_s23 + $0x90] sm:$0xff] }
  0x8f   : > { %v371_v61 = vld [vmem:[%s2414_s23 + $0x290] sm:$0xff]  ;;  %v308_v62 = vld [vmem:[%s2414_s23 + $0x98] sm:$0xff]  ;;  %v309_v0 = vld [vmem:[%s2414_s23 + $0xa0] sm:$0xff] }
  0x90   : > { %v372_v63 = vld [vmem:[%s2414_s23 + $0x298] sm:$0xff]  ;;  %v373_v1 = vld [vmem:[%s2414_s23 + $0x2a0] sm:$0xff]  ;;  %v310_v2 = vld [vmem:[%s2414_s23 + $0xa8] sm:$0xff] }
  0x91   : > { %1818 = vmatpush3.bf16.msra.mxu0 %v1815_v16  ;;  %1843 = vmatpush3.bf16.msra.mxu1 %v1815_v16  ;;  %v374_v3 = vld [vmem:[%s2414_s23 + $0x2a8] sm:$0xff]  ;;  %v311_v4 = vld [vmem:[%s2414_s23 + $0xb0] sm:$0xff]  ;;  %v312_v6 = vld [vmem:[%s2414_s23 + $0xb8] sm:$0xff] }
  0x92   : > { %1820 = vmatprep.subr.bf16.mxu0 %v1819_v19  ;;  %1836 = vmatprep.subr.bf16.mxu1 %v1819_v19  ;;  %v375_v5 = vld [vmem:[%s2414_s23 + $0x2b0] sm:$0xff]  ;;  %v376_v7 = vld [vmem:[%s2414_s23 + $0x2b8] sm:$0xff]  ;;  %v313_v8 = vld [vmem:[%s2414_s23 + $0xc0] sm:$0xff] }
  0x93   : > { %v377_v9 = vld [vmem:[%s2414_s23 + $0x2c0] sm:$0xff]  ;;  %v314_v10 = vld [vmem:[%s2414_s23 + $0xc8] sm:$0xff]  ;;  %v315_v12 = vld [vmem:[%s2414_s23 + $0xd0] sm:$0xff] }
  0x94   : > { %v378_v11 = vld [vmem:[%s2414_s23 + $0x2c8] sm:$0xff]  ;;  %v379_v13 = vld [vmem:[%s2414_s23 + $0x2d0] sm:$0xff]  ;;  %v316_v14 = vld [vmem:[%s2414_s23 + $0xd8] sm:$0xff] }
  0x95   : > { %1822 = vmatpush3.bf16.msra.mxu0 %v1819_v19  ;;  %1844 = vmatpush3.bf16.msra.mxu1 %v1819_v19  ;;  %v380_v15 = vld [vmem:[%s2414_s23 + $0x2d8] sm:$0xff]  ;;  %v317_v16 = vld [vmem:[%s2414_s23 + $0xe0] sm:$0xff]  ;;  %v318_v18 = vld [vmem:[%s2414_s23 + $0xe8] sm:$0xff] }
  0x96   : > { %1824 = vmatprep.subr.bf16.mxu0 %v1823_v22  ;;  %1837 = vmatprep.subr.bf16.mxu1 %v1823_v22  ;;  %v381_v17 = vld [vmem:[%s2414_s23 + $0x2e0] sm:$0xff]  ;;  %v382_v19 = vld [vmem:[%s2414_s23 + $0x2e8] sm:$0xff]  ;;  %v319_v20 = vld [vmem:[%s2414_s23 + $0xf0] sm:$0xff] }
  0x97   : > { %v383_v21 = vld [vmem:[%s2414_s23 + $0x2f0] sm:$0xff]  ;;  %v384_v23 = vld [vmem:[%s2414_s23 + $0x2f8] sm:$0xff]  ;;  %v321_v24 = vld [vmem:[%s2414_s23 + $0x100] sm:$0xff] }
  0x99   : > { %1826 = vmatpush3.bf16.msra.mxu0 %v1823_v22  ;;  %1845 = vmatpush3.bf16.msra.mxu1 %v1823_v22  ;;  %v320_v22 = vld [vmem:[%s2414_s23 + $0xf8] sm:$0xff] }
  0x9a   : > { %1828 = vmatprep.subr.bf16.mxu0 %v1827_v25  ;;  %1838 = vmatprep.subr.bf16.mxu1 %v1827_v25 }
  0x9d   : > { %1830 = vmatpush3.bf16.msra.mxu0 %v1827_v25  ;;  %1846 = vmatpush3.bf16.msra.mxu1 %v1827_v25  ;;  %v385_v25 = vld [vmem:[%s2414_s23 + $0x300] sm:$0xff] }
  0xa0   : > { %1608 = vmatmul.mubr.f32.vlgmr.msra.gmra.mrb[0].mxu0 %v290_v26  ;;  %1704 = vmatmul.mubr.f32.vlgmr.msra.gmra.mrb[0].mxu1 %v354_v27  ;;  %v322_v26 = vld [vmem:[%s2414_s23 + $0x108] sm:$0xff] }
  0xa1   : > { %1610 = vmatprep.mubr.f32.mxu0 %v291_v28  ;;  %1706 = vmatprep.mubr.f32.mxu1 %v355_v29  ;;  %v386_v27 = vld [vmem:[%s2414_s23 + $0x308] sm:$0xff]  ;;  %v323_v28 = vld [vmem:[%s2414_s23 + $0x110] sm:$0xff] }
  0xa2   : > { %v387_v29 = vld [vmem:[%s2414_s23 + $0x310] sm:$0xff] }
  0xa4   : > { %1611 = vmatmul.mubr.f32.gmra.mrb[2].mxu0 %v292_v30  ;;  %1707 = vmatmul.mubr.f32.gmra.mrb[2].mxu1 %v356_v31  ;;  %v324_v30 = vld [vmem:[%s2414_s23 + $0x118] sm:$0xff] }
  0xa5   : > { %1613 = vmatprep.mubr.f32.mxu0 %v293_v32  ;;  %1709 = vmatprep.mubr.f32.mxu1 %v357_v33  ;;  %v388_v31 = vld [vmem:[%s2414_s23 + $0x318] sm:$0xff]  ;;  %v325_v32 = vld [vmem:[%s2414_s23 + $0x120] sm:$0xff] }
  0xa6   : > { %v389_v33 = vld [vmem:[%s2414_s23 + $0x320] sm:$0xff] }
  0xa8   : > { %1614 = vmatmul.mubr.f32.gmra.mrb[4].mxu0 %v294_v34  ;;  %1710 = vmatmul.mubr.f32.gmra.mrb[4].mxu1 %v358_v35  ;;  %v326_v34 = vld [vmem:[%s2414_s23 + $0x128] sm:$0xff] }
  0xa9   : > { %1616 = vmatprep.mubr.f32.mxu0 %v295_v36  ;;  %1712 = vmatprep.mubr.f32.mxu1 %v359_v37  ;;  %v390_v35 = vld [vmem:[%s2414_s23 + $0x328] sm:$0xff]  ;;  %v327_v36 = vld [vmem:[%s2414_s23 + $0x130] sm:$0xff] }
  0xaa   : > { %v391_v37 = vld [vmem:[%s2414_s23 + $0x330] sm:$0xff] }
  0xac   : > { %1617 = vmatmul.mubr.f32.gmra.mrb[6].mxu0 %v296_v38  ;;  %1713 = vmatmul.mubr.f32.gmra.mrb[6].mxu1 %v360_v39  ;;  %v328_v38 = vld [vmem:[%s2414_s23 + $0x138] sm:$0xff] }
  0xad   : > { %1619 = vmatprep.mubr.f32.mxu0 %v297_v40  ;;  %1715 = vmatprep.mubr.f32.mxu1 %v361_v41  ;;  %v392_v39 = vld [vmem:[%s2414_s23 + $0x338] sm:$0xff]  ;;  %v329_v40 = vld [vmem:[%s2414_s23 + $0x140] sm:$0xff] }
  0xae   : > { %v393_v41 = vld [vmem:[%s2414_s23 + $0x340] sm:$0xff] }
  0xb0   : > { %1620 = vmatmul.mubr.f32.gmra.mrb[8].mxu0 %v298_v42  ;;  %1716 = vmatmul.mubr.f32.gmra.mrb[8].mxu1 %v362_v43  ;;  %v330_v42 = vld [vmem:[%s2414_s23 + $0x148] sm:$0xff] }
  0xb1   : > { %1622 = vmatprep.mubr.f32.mxu0 %v299_v44  ;;  %1718 = vmatprep.mubr.f32.mxu1 %v363_v45  ;;  %v394_v43 = vld [vmem:[%s2414_s23 + $0x348] sm:$0xff]  ;;  %v331_v44 = vld [vmem:[%s2414_s23 + $0x150] sm:$0xff] }
  0xb2   : > { %v395_v45 = vld [vmem:[%s2414_s23 + $0x350] sm:$0xff] }
  0xb4   : > { %1623 = vmatmul.mubr.f32.gmra.mrb[10].mxu0 %v300_v46  ;;  %1719 = vmatmul.mubr.f32.gmra.mrb[10].mxu1 %v364_v47  ;;  %v332_v46 = vld [vmem:[%s2414_s23 + $0x158] sm:$0xff] }
  0xb5   : > { %1625 = vmatprep.mubr.f32.mxu0 %v301_v48  ;;  %1721 = vmatprep.mubr.f32.mxu1 %v365_v49  ;;  %v396_v47 = vld [vmem:[%s2414_s23 + $0x358] sm:$0xff]  ;;  %v333_v48 = vld [vmem:[%s2414_s23 + $0x160] sm:$0xff] }
  0xb6   : > { %v397_v49 = vld [vmem:[%s2414_s23 + $0x360] sm:$0xff] }
  0xb8   : > { %1626 = vmatmul.mubr.f32.gmra.mrb[12].mxu0 %v302_v50  ;;  %1722 = vmatmul.mubr.f32.gmra.mrb[12].mxu1 %v366_v51  ;;  %v334_v50 = vld [vmem:[%s2414_s23 + $0x168] sm:$0xff] }
  0xb9   : > { %1628 = vmatprep.mubr.f32.mxu0 %v303_v52  ;;  %1724 = vmatprep.mubr.f32.mxu1 %v367_v53  ;;  %v398_v51 = vld [vmem:[%s2414_s23 + $0x368] sm:$0xff]  ;;  %v335_v52 = vld [vmem:[%s2414_s23 + $0x170] sm:$0xff] }
  0xba   : > { %v399_v53 = vld [vmem:[%s2414_s23 + $0x370] sm:$0xff] }
  0xbc   : > { %1629 = vmatmul.mubr.f32.gmra.mrb[14].mxu0 %v304_v54  ;;  %1725 = vmatmul.mubr.f32.gmra.mrb[14].mxu1 %v368_v55  ;;  %v336_v54 = vld [vmem:[%s2414_s23 + $0x178] sm:$0xff] }
  0xbd   : > { %1631 = vmatprep.mubr.f32.mxu0 %v305_v56  ;;  %1727 = vmatprep.mubr.f32.mxu1 %v369_v57  ;;  %v400_v55 = vld [vmem:[%s2414_s23 + $0x378] sm:$0xff]  ;;  %v337_v56 = vld [vmem:[%s2414_s23 + $0x180] sm:$0xff] }
  0xbe   : > { %v401_v57 = vld [vmem:[%s2414_s23 + $0x380] sm:$0xff] }
  0xc0   : > { %1632 = vmatmul.mubr.f32.gmra.mrb[16].mxu0 %v306_v58  ;;  %1728 = vmatmul.mubr.f32.gmra.mrb[16].mxu1 %v370_v59  ;;  %v338_v58 = vld [vmem:[%s2414_s23 + $0x188] sm:$0xff] }
  0xc1   : > { %1634 = vmatprep.mubr.f32.mxu0 %v307_v60  ;;  %1730 = vmatprep.mubr.f32.mxu1 %v371_v61  ;;  %v402_v59 = vld [vmem:[%s2414_s23 + $0x388] sm:$0xff]  ;;  %v339_v60 = vld [vmem:[%s2414_s23 + $0x190] sm:$0xff] }
  0xc2   : > { %v403_v61 = vld [vmem:[%s2414_s23 + $0x390] sm:$0xff] }
  0xc4   : > { %1635 = vmatmul.mubr.f32.gmra.mrb[18].mxu0 %v308_v62  ;;  %1731 = vmatmul.mubr.f32.gmra.mrb[18].mxu1 %v372_v63  ;;  %v340_v62 = vld [vmem:[%s2414_s23 + $0x198] sm:$0xff] }
  0xc5   : > { %1637 = vmatprep.mubr.f32.mxu0 %v309_v0  ;;  %1733 = vmatprep.mubr.f32.mxu1 %v373_v1  ;;  %v404_v63 = vld [vmem:[%s2414_s23 + $0x398] sm:$0xff]  ;;  %v341_v0 = vld [vmem:[%s2414_s23 + $0x1a0] sm:$0xff] }
  0xc6   : > { %v405_v1 = vld [vmem:[%s2414_s23 + $0x3a0] sm:$0xff] }
  0xc8   : > { %1638 = vmatmul.mubr.f32.gmra.mrb[20].mxu0 %v310_v2  ;;  %1734 = vmatmul.mubr.f32.gmra.mrb[20].mxu1 %v374_v3  ;;  %v342_v2 = vld [vmem:[%s2414_s23 + $0x1a8] sm:$0xff] }
  0xc9   : > { %1640 = vmatprep.mubr.f32.mxu0 %v311_v4  ;;  %1736 = vmatprep.mubr.f32.mxu1 %v375_v5  ;;  %v406_v3 = vld [vmem:[%s2414_s23 + $0x3a8] sm:$0xff]  ;;  %v343_v4 = vld [vmem:[%s2414_s23 + $0x1b0] sm:$0xff] }
  0xca   : > { %v407_v5 = vld [vmem:[%s2414_s23 + $0x3b0] sm:$0xff] }
  0xcc   : > { %1641 = vmatmul.mubr.f32.gmra.mrb[22].mxu0 %v312_v6  ;;  %1737 = vmatmul.mubr.f32.gmra.mrb[22].mxu1 %v376_v7  ;;  %v344_v6 = vld [vmem:[%s2414_s23 + $0x1b8] sm:$0xff] }
  0xcd   : > { %1643 = vmatprep.mubr.f32.mxu0 %v313_v8  ;;  %1739 = vmatprep.mubr.f32.mxu1 %v377_v9  ;;  %v408_v7 = vld [vmem:[%s2414_s23 + $0x3b8] sm:$0xff]  ;;  %v345_v8 = vld [vmem:[%s2414_s23 + $0x1c0] sm:$0xff] }
  0xce   : > { %v409_v9 = vld [vmem:[%s2414_s23 + $0x3c0] sm:$0xff] }
  0xd0   : > { %1644 = vmatmul.mubr.f32.gmra.mrb[24].mxu0 %v314_v10  ;;  %1740 = vmatmul.mubr.f32.gmra.mrb[24].mxu1 %v378_v11  ;;  %v346_v10 = vld [vmem:[%s2414_s23 + $0x1c8] sm:$0xff] }
  0xd1   : > { %1646 = vmatprep.mubr.f32.mxu0 %v315_v12  ;;  %1742 = vmatprep.mubr.f32.mxu1 %v379_v13  ;;  %v410_v11 = vld [vmem:[%s2414_s23 + $0x3c8] sm:$0xff]  ;;  %v347_v12 = vld [vmem:[%s2414_s23 + $0x1d0] sm:$0xff] }
  0xd2   : > { %v411_v13 = vld [vmem:[%s2414_s23 + $0x3d0] sm:$0xff] }
  0xd4   : > { %1647 = vmatmul.mubr.f32.gmra.mrb[26].mxu0 %v316_v14  ;;  %1743 = vmatmul.mubr.f32.gmra.mrb[26].mxu1 %v380_v15  ;;  %v348_v14 = vld [vmem:[%s2414_s23 + $0x1d8] sm:$0xff] }
  0xd5   : > { %1649 = vmatprep.mubr.f32.mxu0 %v317_v16  ;;  %1745 = vmatprep.mubr.f32.mxu1 %v381_v17  ;;  %v412_v15 = vld [vmem:[%s2414_s23 + $0x3d8] sm:$0xff]  ;;  %v349_v16 = vld [vmem:[%s2414_s23 + $0x1e0] sm:$0xff] }
  0xd6   : > { %v413_v17 = vld [vmem:[%s2414_s23 + $0x3e0] sm:$0xff] }
  0xd8   : > { %1650 = vmatmul.mubr.f32.gmra.mrb[28].mxu0 %v318_v18  ;;  %1746 = vmatmul.mubr.f32.gmra.mrb[28].mxu1 %v382_v19  ;;  %v350_v18 = vld [vmem:[%s2414_s23 + $0x1e8] sm:$0xff] }
  0xd9   : > { %1652 = vmatprep.mubr.f32.mxu0 %v319_v20  ;;  %1748 = vmatprep.mubr.f32.mxu1 %v383_v21  ;;  %v414_v19 = vld [vmem:[%s2414_s23 + $0x3e8] sm:$0xff]  ;;  %v351_v20 = vld [vmem:[%s2414_s23 + $0x1f0] sm:$0xff] }
  0xda   : > { %v415_v21 = vld [vmem:[%s2414_s23 + $0x3f0] sm:$0xff] }
  0xdc   : > { %1653 = vmatmul.mubr.f32.gmra.mrb[30].mxu0 %v320_v22  ;;  %1749 = vmatmul.mubr.f32.gmra.mrb[30].mxu1 %v384_v23  ;;  %v352_v22 = vld [vmem:[%s2414_s23 + $0x1f8] sm:$0xff] }
  0xdd   : > { %1655 = vmatprep.mubr.f32.mxu0 %v321_v24  ;;  %1751 = vmatprep.mubr.f32.mxu1 %v385_v25  ;;  %v416_v23 = vld [vmem:[%s2414_s23 + $0x3f8] sm:$0xff]  ;;  %s2136_s23 = smov [#allocation9]  }
  0xde   : > { %v2575_v24 = vld [vmem:[%s286_s11] ss:$0 sm:$0xff]  ;;  %s2021_s1 = sshll.u32 %s2136_s23, 4  ;;  %s2022_s1 = int_to_ptr.vmem [resolvable:$false] %s2021_s1 }
  0xdf   : > { %s2023_s24 = scalar_lea.vmem %s2022_s1, 32768  ;;  %p2024_p7 = scmp.lt.s32.totalorder %s2838_s21, %s2022_s1 }
  0xe0   : > { %1656 = vmatmul.mubr.f32.gmra.mrb[32].mxu0 %v322_v26  ;;  %1752 = vmatmul.mubr.f32.gmra.mrb[32].mxu1 %v386_v27  ;;  %p2025_p5 = scmp.lt.s32.totalorder %s2023_s24, %s2017_s25 }
  0xe1   : > { %1658 = vmatprep.mubr.f32.mxu0 %v323_v28  ;;  %1754 = vmatprep.mubr.f32.mxu1 %v387_v29 }
  0xe2   : > { %p2026_p8 = por %p2025_p5, %p2024_p7 }
  0xe4   : > { %1659 = vmatmul.mubr.f32.gmra.mrb[34].mxu0 %v324_v30  ;;  %1755 = vmatmul.mubr.f32.gmra.mrb[34].mxu1 %v388_v31  ;;  %p2027_p12 = pnand %p2026_p8, %p2020_p11 }
  0xe5   : > { %1661 = vmatprep.mubr.f32.mxu0 %v325_v32  ;;  %1757 = vmatprep.mubr.f32.mxu1 %v389_v33 }
  0xe8   : > { %1662 = vmatmul.mubr.f32.gmra.mrb[36].mxu0 %v326_v34  ;;  %1758 = vmatmul.mubr.f32.gmra.mrb[36].mxu1 %v390_v35 }
  0xe9   : > { %1664 = vmatprep.mubr.f32.mxu0 %v327_v36  ;;  %1760 = vmatprep.mubr.f32.mxu1 %v391_v37 }
  0xec   : > { %1665 = vmatmul.mubr.f32.gmra.mrb[38].mxu0 %v328_v38  ;;  %1761 = vmatmul.mubr.f32.gmra.mrb[38].mxu1 %v392_v39 }
  0xed   : > { %1667 = vmatprep.mubr.f32.mxu0 %v329_v40  ;;  %1763 = vmatprep.mubr.f32.mxu1 %v393_v41 }
  0xf0   : > { %1668 = vmatmul.mubr.f32.gmra.mrb[40].mxu0 %v330_v42  ;;  %1764 = vmatmul.mubr.f32.gmra.mrb[40].mxu1 %v394_v43 }
  0xf1   : > { %1670 = vmatprep.mubr.f32.mxu0 %v331_v44  ;;  %1766 = vmatprep.mubr.f32.mxu1 %v395_v45 }
  0xf4   : > { %1671 = vmatmul.mubr.f32.gmra.mrb[42].mxu0 %v332_v46  ;;  %1767 = vmatmul.mubr.f32.gmra.mrb[42].mxu1 %v396_v47 }
  0xf5   : > { %1673 = vmatprep.mubr.f32.mxu0 %v333_v48  ;;  %1769 = vmatprep.mubr.f32.mxu1 %v397_v49 }
  0xf8   : > { %1674 = vmatmul.mubr.f32.gmra.mrb[44].mxu0 %v334_v50  ;;  %1770 = vmatmul.mubr.f32.gmra.mrb[44].mxu1 %v398_v51 }
  0xf9   : > { %1676 = vmatprep.mubr.f32.mxu0 %v335_v52  ;;  %1772 = vmatprep.mubr.f32.mxu1 %v399_v53 }
  0xfc   : > { %1677 = vmatmul.mubr.f32.gmra.mrb[46].mxu0 %v336_v54  ;;  %1773 = vmatmul.mubr.f32.gmra.mrb[46].mxu1 %v400_v55 }
  0xfd   : > { %1679 = vmatprep.mubr.f32.mxu0 %v337_v56  ;;  %1775 = vmatprep.mubr.f32.mxu1 %v401_v57 }
 0x100   : > { %1680 = vmatmul.mubr.f32.gmra.mrb[48].mxu0 %v338_v58  ;;  %1776 = vmatmul.mubr.f32.gmra.mrb[48].mxu1 %v402_v59 }
 0x101   : > { %1682 = vmatprep.mubr.f32.mxu0 %v339_v60  ;;  %1778 = vmatprep.mubr.f32.mxu1 %v403_v61 }
 0x104   : > { %1683 = vmatmul.mubr.f32.gmra.mrb[50].mxu0 %v340_v62  ;;  %1779 = vmatmul.mubr.f32.gmra.mrb[50].mxu1 %v404_v63 }
 0x105   : > { %1685 = vmatprep.mubr.f32.mxu0 %v341_v0  ;;  %1781 = vmatprep.mubr.f32.mxu1 %v405_v1 }
 0x108   : > { %1686 = vmatmul.mubr.f32.gmra.mrb[52].mxu0 %v342_v2  ;;  %1782 = vmatmul.mubr.f32.gmra.mrb[52].mxu1 %v406_v3 }
 0x109   : > { %1688 = vmatprep.mubr.f32.mxu0 %v343_v4  ;;  %1784 = vmatprep.mubr.f32.mxu1 %v407_v5 }
 0x10c   : > { %1689 = vmatmul.mubr.f32.gmra.mrb[54].mxu0 %v344_v6  ;;  %1785 = vmatmul.mubr.f32.gmra.mrb[54].mxu1 %v408_v7 }
 0x10d   : > { %1691 = vmatprep.mubr.f32.mxu0 %v345_v8  ;;  %1787 = vmatprep.mubr.f32.mxu1 %v409_v9 }
 0x110   : > { %1692 = vmatmul.mubr.f32.gmra.mrb[56].mxu0 %v346_v10  ;;  %1788 = vmatmul.mubr.f32.gmra.mrb[56].mxu1 %v410_v11 }
 0x111   : > { %1694 = vmatprep.mubr.f32.mxu0 %v347_v12  ;;  %1790 = vmatprep.mubr.f32.mxu1 %v411_v13 }
 0x114   : > { %1695 = vmatmul.mubr.f32.gmra.mrb[58].mxu0 %v348_v14  ;;  %1791 = vmatmul.mubr.f32.gmra.mrb[58].mxu1 %v412_v15 }
 0x115   : > { %1697 = vmatprep.mubr.f32.mxu0 %v349_v16  ;;  %1793 = vmatprep.mubr.f32.mxu1 %v413_v17 }
 0x118   : > { %1698 = vmatmul.mubr.f32.gmra.mrb[60].mxu0 %v350_v18  ;;  %1794 = vmatmul.mubr.f32.gmra.mrb[60].mxu1 %v414_v19 }
 0x119   : > { %1700 = vmatprep.mubr.f32.mxu0 %v351_v20  ;;  %1796 = vmatprep.mubr.f32.mxu1 %v415_v21 }
 0x11c   : > { %1701 = vmatmul.mubr.f32.gmra.mrb[62].mxu0 %v352_v22  ;;  %1797 = vmatmul.mubr.f32.gmra.mrb[62].mxu1 %v416_v23 }
 0x173   : > { %v1609_v25 = vpop.f32.mrb[0].mxu0  ;;  %v1705_v26 = vpop.f32.mrb[0].mxu1 }
 0x174   : > { %v512_v27 = vadd.f32 %v1609_v25, %v2575_v24  ;;  %v832_v28 = vadd.f32 %v1705_v26, %v2575_v24  ;;  %v506_v29 = vpop.f32.mrb[1].mxu0  ;;  %v826_v30 = vpop.f32.mrb[1].mxu1 }
 0x175   : > { %v507_v31 = vadd.f32 %v2575_v24, %v506_v29  ;;  %v827_v32 = vadd.f32 %v2575_v24, %v826_v30 }
 0x176   : > { %1146 = vst [vmem:[%s2583_s12 + $0x8] sm:$0xff] %v512_v27  ;;  %1210 = vst [vmem:[%s2583_s12 + $0x208] sm:$0xff] %v832_v28 }
 0x177   : > { %1145 = vst [vmem:[%s2583_s12] sm:$0xff] %v507_v31  ;;  %1209 = vst [vmem:[%s2583_s12 + $0x200] sm:$0xff] %v827_v32  ;;  %v1612_v33 = vpop.f32.mrb[2].mxu0  ;;  %v1708_v34 = vpop.f32.mrb[2].mxu1 }
 0x178   : > { %v522_v35 = vadd.f32 %v1612_v33, %v2575_v24  ;;  %v842_v36 = vadd.f32 %v1708_v34, %v2575_v24  ;;  %v516_v37 = vpop.f32.mrb[3].mxu0  ;;  %v836_v38 = vpop.f32.mrb[3].mxu1 }
 0x179   : > { %v517_v39 = vadd.f32 %v2575_v24, %v516_v37  ;;  %v837_v40 = vadd.f32 %v2575_v24, %v836_v38 }
 0x17a   : > { %1148 = vst [vmem:[%s2583_s12 + $0x18] sm:$0xff] %v522_v35  ;;  %1212 = vst [vmem:[%s2583_s12 + $0x218] sm:$0xff] %v842_v36 }
 0x17b   : > { %1147 = vst [vmem:[%s2583_s12 + $0x10] sm:$0xff] %v517_v39  ;;  %1211 = vst [vmem:[%s2583_s12 + $0x210] sm:$0xff] %v837_v40  ;;  %v1615_v41 = vpop.f32.mrb[4].mxu0  ;;  %v1711_v42 = vpop.f32.mrb[4].mxu1 }
 0x17c   : > { %v532_v43 = vadd.f32 %v1615_v41, %v2575_v24  ;;  %v852_v44 = vadd.f32 %v1711_v42, %v2575_v24  ;;  %v526_v45 = vpop.f32.mrb[5].mxu0  ;;  %v846_v46 = vpop.f32.mrb[5].mxu1 }
 0x17d   : > { %v527_v47 = vadd.f32 %v2575_v24, %v526_v45  ;;  %v847_v48 = vadd.f32 %v2575_v24, %v846_v46 }
 0x17e   : > { %1150 = vst [vmem:[%s2583_s12 + $0x28] sm:$0xff] %v532_v43  ;;  %1214 = vst [vmem:[%s2583_s12 + $0x228] sm:$0xff] %v852_v44 }
 0x17f   : > { %1149 = vst [vmem:[%s2583_s12 + $0x20] sm:$0xff] %v527_v47  ;;  %1213 = vst [vmem:[%s2583_s12 + $0x220] sm:$0xff] %v847_v48  ;;  %v1618_v49 = vpop.f32.mrb[6].mxu0  ;;  %v1714_v50 = vpop.f32.mrb[6].mxu1 }
 0x180   : > { %v542_v51 = vadd.f32 %v1618_v49, %v2575_v24  ;;  %v862_v52 = vadd.f32 %v1714_v50, %v2575_v24  ;;  %v536_v53 = vpop.f32.mrb[7].mxu0  ;;  %v856_v54 = vpop.f32.mrb[7].mxu1 }
 0x181   : > { %v537_v55 = vadd.f32 %v2575_v24, %v536_v53  ;;  %v857_v56 = vadd.f32 %v2575_v24, %v856_v54 }
 0x182   : > { %1152 = vst [vmem:[%s2583_s12 + $0x38] sm:$0xff] %v542_v51  ;;  %1216 = vst [vmem:[%s2583_s12 + $0x238] sm:$0xff] %v862_v52 }
 0x183   : > { %1151 = vst [vmem:[%s2583_s12 + $0x30] sm:$0xff] %v537_v55  ;;  %1215 = vst [vmem:[%s2583_s12 + $0x230] sm:$0xff] %v857_v56  ;;  %v1621_v57 = vpop.f32.mrb[8].mxu0  ;;  %v1717_v58 = vpop.f32.mrb[8].mxu1 }
 0x184   : > { %v552_v59 = vadd.f32 %v1621_v57, %v2575_v24  ;;  %v872_v60 = vadd.f32 %v1717_v58, %v2575_v24  ;;  %v546_v61 = vpop.f32.mrb[9].mxu0  ;;  %v866_v62 = vpop.f32.mrb[9].mxu1 }
 0x185   : > { %v547_v63 = vadd.f32 %v2575_v24, %v546_v61  ;;  %v867_v0 = vadd.f32 %v2575_v24, %v866_v62 }
 0x186   : > { %1154 = vst [vmem:[%s2583_s12 + $0x48] sm:$0xff] %v552_v59  ;;  %1218 = vst [vmem:[%s2583_s12 + $0x248] sm:$0xff] %v872_v60 }
 0x187   : > { %1153 = vst [vmem:[%s2583_s12 + $0x40] sm:$0xff] %v547_v63  ;;  %1217 = vst [vmem:[%s2583_s12 + $0x240] sm:$0xff] %v867_v0  ;;  %v1624_v1 = vpop.f32.mrb[10].mxu0  ;;  %v1720_v2 = vpop.f32.mrb[10].mxu1 }
 0x188   : > { %v562_v3 = vadd.f32 %v1624_v1, %v2575_v24  ;;  %v882_v4 = vadd.f32 %v1720_v2, %v2575_v24  ;;  %v556_v5 = vpop.f32.mrb[11].mxu0  ;;  %v876_v6 = vpop.f32.mrb[11].mxu1 }
 0x189   : > { %v557_v7 = vadd.f32 %v2575_v24, %v556_v5  ;;  %v877_v8 = vadd.f32 %v2575_v24, %v876_v6 }
 0x18a   : > { %1156 = vst [vmem:[%s2583_s12 + $0x58] sm:$0xff] %v562_v3  ;;  %1220 = vst [vmem:[%s2583_s12 + $0x258] sm:$0xff] %v882_v4 }
 0x18b   : > { %1155 = vst [vmem:[%s2583_s12 + $0x50] sm:$0xff] %v557_v7  ;;  %1219 = vst [vmem:[%s2583_s12 + $0x250] sm:$0xff] %v877_v8  ;;  %v1627_v9 = vpop.f32.mrb[12].mxu0  ;;  %v1723_v10 = vpop.f32.mrb[12].mxu1 }
 0x18c   : > { %v572_v11 = vadd.f32 %v1627_v9, %v2575_v24  ;;  %v892_v12 = vadd.f32 %v1723_v10, %v2575_v24  ;;  %v566_v13 = vpop.f32.mrb[13].mxu0  ;;  %v886_v14 = vpop.f32.mrb[13].mxu1 }
 0x18d   : > { %v567_v15 = vadd.f32 %v2575_v24, %v566_v13  ;;  %v887_v16 = vadd.f32 %v2575_v24, %v886_v14 }
 0x18e   : > { %1158 = vst [vmem:[%s2583_s12 + $0x68] sm:$0xff] %v572_v11  ;;  %1222 = vst [vmem:[%s2583_s12 + $0x268] sm:$0xff] %v892_v12 }
 0x18f   : > { %1157 = vst [vmem:[%s2583_s12 + $0x60] sm:$0xff] %v567_v15  ;;  %1221 = vst [vmem:[%s2583_s12 + $0x260] sm:$0xff] %v887_v16  ;;  %v1630_v17 = vpop.f32.mrb[14].mxu0  ;;  %v1726_v18 = vpop.f32.mrb[14].mxu1 }
 0x190   : > { %v582_v19 = vadd.f32 %v1630_v17, %v2575_v24  ;;  %v902_v20 = vadd.f32 %v1726_v18, %v2575_v24  ;;  %v576_v21 = vpop.f32.mrb[15].mxu0  ;;  %v896_v22 = vpop.f32.mrb[15].mxu1 }
 0x191   : > { %v577_v23 = vadd.f32 %v2575_v24, %v576_v21  ;;  %v897_v25 = vadd.f32 %v2575_v24, %v896_v22 }
 0x192   : > { %1160 = vst [vmem:[%s2583_s12 + $0x78] sm:$0xff] %v582_v19  ;;  %1224 = vst [vmem:[%s2583_s12 + $0x278] sm:$0xff] %v902_v20 }
 0x193   : > { %1159 = vst [vmem:[%s2583_s12 + $0x70] sm:$0xff] %v577_v23  ;;  %1223 = vst [vmem:[%s2583_s12 + $0x270] sm:$0xff] %v897_v25  ;;  %v1633_v26 = vpop.f32.mrb[16].mxu0  ;;  %v1729_v27 = vpop.f32.mrb[16].mxu1 }
 0x194   : > { %v592_v28 = vadd.f32 %v1633_v26, %v2575_v24  ;;  %v912_v29 = vadd.f32 %v1729_v27, %v2575_v24  ;;  %v586_v30 = vpop.f32.mrb[17].mxu0  ;;  %v906_v31 = vpop.f32.mrb[17].mxu1 }
 0x195   : > { %v587_v32 = vadd.f32 %v2575_v24, %v586_v30  ;;  %v907_v33 = vadd.f32 %v2575_v24, %v906_v31 }
 0x196   : > { %1162 = vst [vmem:[%s2583_s12 + $0x88] sm:$0xff] %v592_v28  ;;  %1226 = vst [vmem:[%s2583_s12 + $0x288] sm:$0xff] %v912_v29 }
 0x197   : > { %1161 = vst [vmem:[%s2583_s12 + $0x80] sm:$0xff] %v587_v32  ;;  %1225 = vst [vmem:[%s2583_s12 + $0x280] sm:$0xff] %v907_v33  ;;  %v1636_v34 = vpop.f32.mrb[18].mxu0  ;;  %v1732_v35 = vpop.f32.mrb[18].mxu1 }
 0x198   : > { %v602_v36 = vadd.f32 %v1636_v34, %v2575_v24  ;;  %v922_v37 = vadd.f32 %v1732_v35, %v2575_v24  ;;  %v596_v38 = vpop.f32.mrb[19].mxu0  ;;  %v916_v39 = vpop.f32.mrb[19].mxu1 }
 0x199   : > { %v597_v40 = vadd.f32 %v2575_v24, %v596_v38  ;;  %v917_v41 = vadd.f32 %v2575_v24, %v916_v39 }
 0x19a   : > { %1164 = vst [vmem:[%s2583_s12 + $0x98] sm:$0xff] %v602_v36  ;;  %1228 = vst [vmem:[%s2583_s12 + $0x298] sm:$0xff] %v922_v37 }
 0x19b   : > { %1163 = vst [vmem:[%s2583_s12 + $0x90] sm:$0xff] %v597_v40  ;;  %1227 = vst [vmem:[%s2583_s12 + $0x290] sm:$0xff] %v917_v41  ;;  %v1639_v42 = vpop.f32.mrb[20].mxu0  ;;  %v1735_v43 = vpop.f32.mrb[20].mxu1 }
 0x19c   : > { %v612_v44 = vadd.f32 %v1639_v42, %v2575_v24  ;;  %v932_v45 = vadd.f32 %v1735_v43, %v2575_v24  ;;  %v606_v46 = vpop.f32.mrb[21].mxu0  ;;  %v926_v47 = vpop.f32.mrb[21].mxu1 }
 0x19d   : > { %v607_v48 = vadd.f32 %v2575_v24, %v606_v46  ;;  %v927_v49 = vadd.f32 %v2575_v24, %v926_v47 }
 0x19e   : > { %1166 = vst [vmem:[%s2583_s12 + $0xa8] sm:$0xff] %v612_v44  ;;  %1230 = vst [vmem:[%s2583_s12 + $0x2a8] sm:$0xff] %v932_v45 }
 0x19f   : > { %1165 = vst [vmem:[%s2583_s12 + $0xa0] sm:$0xff] %v607_v48  ;;  %1229 = vst [vmem:[%s2583_s12 + $0x2a0] sm:$0xff] %v927_v49  ;;  %v1642_v50 = vpop.f32.mrb[22].mxu0  ;;  %v1738_v51 = vpop.f32.mrb[22].mxu1 }
 0x1a0   : > { %v622_v52 = vadd.f32 %v1642_v50, %v2575_v24  ;;  %v942_v53 = vadd.f32 %v1738_v51, %v2575_v24  ;;  %v616_v54 = vpop.f32.mrb[23].mxu0  ;;  %v936_v55 = vpop.f32.mrb[23].mxu1 }
 0x1a1   : > { %v617_v56 = vadd.f32 %v2575_v24, %v616_v54  ;;  %v937_v57 = vadd.f32 %v2575_v24, %v936_v55 }
 0x1a2   : > { %1168 = vst [vmem:[%s2583_s12 + $0xb8] sm:$0xff] %v622_v52  ;;  %1232 = vst [vmem:[%s2583_s12 + $0x2b8] sm:$0xff] %v942_v53 }
 0x1a3   : > { %1167 = vst [vmem:[%s2583_s12 + $0xb0] sm:$0xff] %v617_v56  ;;  %1231 = vst [vmem:[%s2583_s12 + $0x2b0] sm:$0xff] %v937_v57  ;;  %v1645_v58 = vpop.f32.mrb[24].mxu0  ;;  %v1741_v59 = vpop.f32.mrb[24].mxu1 }
 0x1a4   : > { %v632_v60 = vadd.f32 %v1645_v58, %v2575_v24  ;;  %v952_v61 = vadd.f32 %v1741_v59, %v2575_v24  ;;  %v626_v62 = vpop.f32.mrb[25].mxu0  ;;  %v946_v63 = vpop.f32.mrb[25].mxu1 }
 0x1a5   : > { %v627_v0 = vadd.f32 %v2575_v24, %v626_v62  ;;  %v947_v1 = vadd.f32 %v2575_v24, %v946_v63 }
 0x1a6   : > { %1170 = vst [vmem:[%s2583_s12 + $0xc8] sm:$0xff] %v632_v60  ;;  %1234 = vst [vmem:[%s2583_s12 + $0x2c8] sm:$0xff] %v952_v61 }
 0x1a7   : > { %1169 = vst [vmem:[%s2583_s12 + $0xc0] sm:$0xff] %v627_v0  ;;  %1233 = vst [vmem:[%s2583_s12 + $0x2c0] sm:$0xff] %v947_v1  ;;  %v1648_v2 = vpop.f32.mrb[26].mxu0  ;;  %v1744_v3 = vpop.f32.mrb[26].mxu1 }
 0x1a8   : > { %v642_v4 = vadd.f32 %v1648_v2, %v2575_v24  ;;  %v962_v5 = vadd.f32 %v1744_v3, %v2575_v24  ;;  %v636_v6 = vpop.f32.mrb[27].mxu0  ;;  %v956_v7 = vpop.f32.mrb[27].mxu1 }
 0x1a9   : > { %v637_v8 = vadd.f32 %v2575_v24, %v636_v6  ;;  %v957_v9 = vadd.f32 %v2575_v24, %v956_v7 }
 0x1aa   : > { %1172 = vst [vmem:[%s2583_s12 + $0xd8] sm:$0xff] %v642_v4  ;;  %1236 = vst [vmem:[%s2583_s12 + $0x2d8] sm:$0xff] %v962_v5 }
 0x1ab   : > { %1171 = vst [vmem:[%s2583_s12 + $0xd0] sm:$0xff] %v637_v8  ;;  %1235 = vst [vmem:[%s2583_s12 + $0x2d0] sm:$0xff] %v957_v9  ;;  %v1651_v10 = vpop.f32.mrb[28].mxu0  ;;  %v1747_v11 = vpop.f32.mrb[28].mxu1 }
 0x1ac   : > { %v652_v12 = vadd.f32 %v1651_v10, %v2575_v24  ;;  %v972_v13 = vadd.f32 %v1747_v11, %v2575_v24  ;;  %v646_v14 = vpop.f32.mrb[29].mxu0  ;;  %v966_v15 = vpop.f32.mrb[29].mxu1 }
 0x1ad   : > { %v647_v16 = vadd.f32 %v2575_v24, %v646_v14  ;;  %v967_v17 = vadd.f32 %v2575_v24, %v966_v15 }
 0x1ae   : > { %1174 = vst [vmem:[%s2583_s12 + $0xe8] sm:$0xff] %v652_v12  ;;  %1238 = vst [vmem:[%s2583_s12 + $0x2e8] sm:$0xff] %v972_v13 }
 0x1af   : > { %1173 = vst [vmem:[%s2583_s12 + $0xe0] sm:$0xff] %v647_v16  ;;  %1237 = vst [vmem:[%s2583_s12 + $0x2e0] sm:$0xff] %v967_v17  ;;  %v1654_v18 = vpop.f32.mrb[30].mxu0  ;;  %v1750_v19 = vpop.f32.mrb[30].mxu1 }
 0x1b0   : > { %v662_v20 = vadd.f32 %v1654_v18, %v2575_v24  ;;  %v982_v21 = vadd.f32 %v1750_v19, %v2575_v24  ;;  %v656_v22 = vpop.f32.mrb[31].mxu0  ;;  %v976_v23 = vpop.f32.mrb[31].mxu1 }
 0x1b1   : > { %v657_v25 = vadd.f32 %v2575_v24, %v656_v22  ;;  %v977_v26 = vadd.f32 %v2575_v24, %v976_v23 }
 0x1b2   : > { %1176 = vst [vmem:[%s2583_s12 + $0xf8] sm:$0xff] %v662_v20  ;;  %1240 = vst [vmem:[%s2583_s12 + $0x2f8] sm:$0xff] %v982_v21 }
 0x1b3   : > { %1175 = vst [vmem:[%s2583_s12 + $0xf0] sm:$0xff] %v657_v25  ;;  %1239 = vst [vmem:[%s2583_s12 + $0x2f0] sm:$0xff] %v977_v26  ;;  %v1657_v27 = vpop.f32.mrb[32].mxu0  ;;  %v1753_v28 = vpop.f32.mrb[32].mxu1 }
 0x1b4   : > { %v672_v29 = vadd.f32 %v1657_v27, %v2575_v24  ;;  %v992_v30 = vadd.f32 %v1753_v28, %v2575_v24  ;;  %v666_v31 = vpop.f32.mrb[33].mxu0  ;;  %v986_v32 = vpop.f32.mrb[33].mxu1 }
 0x1b5   : > { %v667_v33 = vadd.f32 %v2575_v24, %v666_v31  ;;  %v987_v34 = vadd.f32 %v2575_v24, %v986_v32 }
 0x1b6   : > { %1178 = vst [vmem:[%s2583_s12 + $0x108] sm:$0xff] %v672_v29  ;;  %1242 = vst [vmem:[%s2583_s12 + $0x308] sm:$0xff] %v992_v30 }
 0x1b7   : > { %1177 = vst [vmem:[%s2583_s12 + $0x100] sm:$0xff] %v667_v33  ;;  %1241 = vst [vmem:[%s2583_s12 + $0x300] sm:$0xff] %v987_v34  ;;  %v1660_v35 = vpop.f32.mrb[34].mxu0  ;;  %v1756_v36 = vpop.f32.mrb[34].mxu1 }
 0x1b8   : > { %v682_v37 = vadd.f32 %v1660_v35, %v2575_v24  ;;  %v1002_v38 = vadd.f32 %v1756_v36, %v2575_v24  ;;  %v676_v39 = vpop.f32.mrb[35].mxu0  ;;  %v996_v40 = vpop.f32.mrb[35].mxu1 }
 0x1b9   : > { %v677_v41 = vadd.f32 %v2575_v24, %v676_v39  ;;  %v997_v42 = vadd.f32 %v2575_v24, %v996_v40 }
 0x1ba   : > { %1180 = vst [vmem:[%s2583_s12 + $0x118] sm:$0xff] %v682_v37  ;;  %1244 = vst [vmem:[%s2583_s12 + $0x318] sm:$0xff] %v1002_v38 }
 0x1bb   : > { %1179 = vst [vmem:[%s2583_s12 + $0x110] sm:$0xff] %v677_v41  ;;  %1243 = vst [vmem:[%s2583_s12 + $0x310] sm:$0xff] %v997_v42  ;;  %v1663_v43 = vpop.f32.mrb[36].mxu0  ;;  %v1759_v44 = vpop.f32.mrb[36].mxu1 }
 0x1bc   : > { %v692_v45 = vadd.f32 %v1663_v43, %v2575_v24  ;;  %v1012_v46 = vadd.f32 %v1759_v44, %v2575_v24  ;;  %v686_v47 = vpop.f32.mrb[37].mxu0  ;;  %v1006_v48 = vpop.f32.mrb[37].mxu1 }
 0x1bd   : > { %v687_v49 = vadd.f32 %v2575_v24, %v686_v47  ;;  %v1007_v50 = vadd.f32 %v2575_v24, %v1006_v48 }
 0x1be   : > { %1182 = vst [vmem:[%s2583_s12 + $0x128] sm:$0xff] %v692_v45  ;;  %1246 = vst [vmem:[%s2583_s12 + $0x328] sm:$0xff] %v1012_v46 }
 0x1bf   : > { %1181 = vst [vmem:[%s2583_s12 + $0x120] sm:$0xff] %v687_v49  ;;  %1245 = vst [vmem:[%s2583_s12 + $0x320] sm:$0xff] %v1007_v50  ;;  %v1666_v51 = vpop.f32.mrb[38].mxu0  ;;  %v1762_v52 = vpop.f32.mrb[38].mxu1 }
 0x1c0   : > { %v702_v53 = vadd.f32 %v1666_v51, %v2575_v24  ;;  %v1022_v54 = vadd.f32 %v1762_v52, %v2575_v24  ;;  %v696_v55 = vpop.f32.mrb[39].mxu0  ;;  %v1016_v56 = vpop.f32.mrb[39].mxu1 }
 0x1c1   : > { %v697_v57 = vadd.f32 %v2575_v24, %v696_v55  ;;  %v1017_v58 = vadd.f32 %v2575_v24, %v1016_v56 }
 0x1c2   : > { %1184 = vst [vmem:[%s2583_s12 + $0x138] sm:$0xff] %v702_v53  ;;  %1248 = vst [vmem:[%s2583_s12 + $0x338] sm:$0xff] %v1022_v54 }
 0x1c3   : > { %1183 = vst [vmem:[%s2583_s12 + $0x130] sm:$0xff] %v697_v57  ;;  %1247 = vst [vmem:[%s2583_s12 + $0x330] sm:$0xff] %v1017_v58  ;;  %v1669_v59 = vpop.f32.mrb[40].mxu0  ;;  %v1765_v60 = vpop.f32.mrb[40].mxu1 }
 0x1c4   : > { %v712_v61 = vadd.f32 %v1669_v59, %v2575_v24  ;;  %v1032_v62 = vadd.f32 %v1765_v60, %v2575_v24  ;;  %v706_v63 = vpop.f32.mrb[41].mxu0  ;;  %v1026_v0 = vpop.f32.mrb[41].mxu1 }
 0x1c5   : > { %v707_v1 = vadd.f32 %v2575_v24, %v706_v63  ;;  %v1027_v2 = vadd.f32 %v2575_v24, %v1026_v0 }
 0x1c6   : > { %1186 = vst [vmem:[%s2583_s12 + $0x148] sm:$0xff] %v712_v61  ;;  %1250 = vst [vmem:[%s2583_s12 + $0x348] sm:$0xff] %v1032_v62 }
 0x1c7   : > { %1185 = vst [vmem:[%s2583_s12 + $0x140] sm:$0xff] %v707_v1  ;;  %1249 = vst [vmem:[%s2583_s12 + $0x340] sm:$0xff] %v1027_v2  ;;  %v1672_v3 = vpop.f32.mrb[42].mxu0  ;;  %v1768_v4 = vpop.f32.mrb[42].mxu1 }
 0x1c8   : > { %v722_v5 = vadd.f32 %v1672_v3, %v2575_v24  ;;  %v1042_v6 = vadd.f32 %v1768_v4, %v2575_v24  ;;  %v716_v7 = vpop.f32.mrb[43].mxu0  ;;  %v1036_v8 = vpop.f32.mrb[43].mxu1 }
 0x1c9   : > { %v717_v9 = vadd.f32 %v2575_v24, %v716_v7  ;;  %v1037_v10 = vadd.f32 %v2575_v24, %v1036_v8 }
 0x1ca   : > { %1188 = vst [vmem:[%s2583_s12 + $0x158] sm:$0xff] %v722_v5  ;;  %1252 = vst [vmem:[%s2583_s12 + $0x358] sm:$0xff] %v1042_v6 }
 0x1cb   : > { %1187 = vst [vmem:[%s2583_s12 + $0x150] sm:$0xff] %v717_v9  ;;  %1251 = vst [vmem:[%s2583_s12 + $0x350] sm:$0xff] %v1037_v10  ;;  %v1675_v11 = vpop.f32.mrb[44].mxu0  ;;  %v1771_v12 = vpop.f32.mrb[44].mxu1 }
 0x1cc   : > { %v732_v13 = vadd.f32 %v1675_v11, %v2575_v24  ;;  %v1052_v14 = vadd.f32 %v1771_v12, %v2575_v24  ;;  %v726_v15 = vpop.f32.mrb[45].mxu0  ;;  %v1046_v16 = vpop.f32.mrb[45].mxu1 }
 0x1cd   : > { %v727_v17 = vadd.f32 %v2575_v24, %v726_v15  ;;  %v1047_v18 = vadd.f32 %v2575_v24, %v1046_v16 }
 0x1ce   : > { %1190 = vst [vmem:[%s2583_s12 + $0x168] sm:$0xff] %v732_v13  ;;  %1254 = vst [vmem:[%s2583_s12 + $0x368] sm:$0xff] %v1052_v14 }
 0x1cf   : > { %1189 = vst [vmem:[%s2583_s12 + $0x160] sm:$0xff] %v727_v17  ;;  %1253 = vst [vmem:[%s2583_s12 + $0x360] sm:$0xff] %v1047_v18  ;;  %v1678_v19 = vpop.f32.mrb[46].mxu0  ;;  %v1774_v20 = vpop.f32.mrb[46].mxu1 }
 0x1d0   : > { %v742_v21 = vadd.f32 %v1678_v19, %v2575_v24  ;;  %v1062_v22 = vadd.f32 %v1774_v20, %v2575_v24  ;;  %v736_v23 = vpop.f32.mrb[47].mxu0  ;;  %v1056_v25 = vpop.f32.mrb[47].mxu1 }
 0x1d1   : > { %v737_v26 = vadd.f32 %v2575_v24, %v736_v23  ;;  %v1057_v27 = vadd.f32 %v2575_v24, %v1056_v25 }
 0x1d2   : > { %1192 = vst [vmem:[%s2583_s12 + $0x178] sm:$0xff] %v742_v21  ;;  %1256 = vst [vmem:[%s2583_s12 + $0x378] sm:$0xff] %v1062_v22 }
 0x1d3   : > { %1191 = vst [vmem:[%s2583_s12 + $0x170] sm:$0xff] %v737_v26  ;;  %1255 = vst [vmem:[%s2583_s12 + $0x370] sm:$0xff] %v1057_v27  ;;  %v1681_v28 = vpop.f32.mrb[48].mxu0  ;;  %v1777_v29 = vpop.f32.mrb[48].mxu1 }
 0x1d4   : > { %v752_v30 = vadd.f32 %v1681_v28, %v2575_v24  ;;  %v1072_v31 = vadd.f32 %v1777_v29, %v2575_v24  ;;  %v746_v32 = vpop.f32.mrb[49].mxu0  ;;  %v1066_v33 = vpop.f32.mrb[49].mxu1 }
 0x1d5   : > { %v747_v34 = vadd.f32 %v2575_v24, %v746_v32  ;;  %v1067_v35 = vadd.f32 %v2575_v24, %v1066_v33 }
 0x1d6   : > { %1194 = vst [vmem:[%s2583_s12 + $0x188] sm:$0xff] %v752_v30  ;;  %1258 = vst [vmem:[%s2583_s12 + $0x388] sm:$0xff] %v1072_v31 }
 0x1d7   : > { %1193 = vst [vmem:[%s2583_s12 + $0x180] sm:$0xff] %v747_v34  ;;  %1257 = vst [vmem:[%s2583_s12 + $0x380] sm:$0xff] %v1067_v35  ;;  %v1684_v36 = vpop.f32.mrb[50].mxu0  ;;  %v1780_v37 = vpop.f32.mrb[50].mxu1 }
 0x1d8   : > { %v762_v38 = vadd.f32 %v1684_v36, %v2575_v24  ;;  %v1082_v39 = vadd.f32 %v1780_v37, %v2575_v24  ;;  %v756_v40 = vpop.f32.mrb[51].mxu0  ;;  %v1076_v41 = vpop.f32.mrb[51].mxu1 }
 0x1d9   : > { %v757_v42 = vadd.f32 %v2575_v24, %v756_v40  ;;  %v1077_v43 = vadd.f32 %v2575_v24, %v1076_v41 }
 0x1da   : > { %1196 = vst [vmem:[%s2583_s12 + $0x198] sm:$0xff] %v762_v38  ;;  %1260 = vst [vmem:[%s2583_s12 + $0x398] sm:$0xff] %v1082_v39 }
 0x1db   : > { %1195 = vst [vmem:[%s2583_s12 + $0x190] sm:$0xff] %v757_v42  ;;  %1259 = vst [vmem:[%s2583_s12 + $0x390] sm:$0xff] %v1077_v43  ;;  %v1687_v44 = vpop.f32.mrb[52].mxu0  ;;  %v1783_v45 = vpop.f32.mrb[52].mxu1 }
 0x1dc   : > { %v772_v46 = vadd.f32 %v1687_v44, %v2575_v24  ;;  %v1092_v47 = vadd.f32 %v1783_v45, %v2575_v24  ;;  %v766_v48 = vpop.f32.mrb[53].mxu0  ;;  %v1086_v49 = vpop.f32.mrb[53].mxu1 }
 0x1dd   : > { %v767_v50 = vadd.f32 %v2575_v24, %v766_v48  ;;  %v1087_v51 = vadd.f32 %v2575_v24, %v1086_v49 }
 0x1de   : > { %1198 = vst [vmem:[%s2583_s12 + $0x1a8] sm:$0xff] %v772_v46  ;;  %1262 = vst [vmem:[%s2583_s12 + $0x3a8] sm:$0xff] %v1092_v47 }
 0x1df   : > { %1197 = vst [vmem:[%s2583_s12 + $0x1a0] sm:$0xff] %v767_v50  ;;  %1261 = vst [vmem:[%s2583_s12 + $0x3a0] sm:$0xff] %v1087_v51  ;;  %v1690_v52 = vpop.f32.mrb[54].mxu0  ;;  %v1786_v53 = vpop.f32.mrb[54].mxu1 }
 0x1e0   : > { %v782_v54 = vadd.f32 %v1690_v52, %v2575_v24  ;;  %v1102_v55 = vadd.f32 %v1786_v53, %v2575_v24  ;;  %v776_v56 = vpop.f32.mrb[55].mxu0  ;;  %v1096_v57 = vpop.f32.mrb[55].mxu1 }
 0x1e1   : > { %v777_v58 = vadd.f32 %v2575_v24, %v776_v56  ;;  %v1097_v59 = vadd.f32 %v2575_v24, %v1096_v57 }
 0x1e2   : > { %1200 = vst [vmem:[%s2583_s12 + $0x1b8] sm:$0xff] %v782_v54  ;;  %1264 = vst [vmem:[%s2583_s12 + $0x3b8] sm:$0xff] %v1102_v55 }
 0x1e3   : > { %1199 = vst [vmem:[%s2583_s12 + $0x1b0] sm:$0xff] %v777_v58  ;;  %1263 = vst [vmem:[%s2583_s12 + $0x3b0] sm:$0xff] %v1097_v59  ;;  %v1693_v60 = vpop.f32.mrb[56].mxu0  ;;  %v1789_v61 = vpop.f32.mrb[56].mxu1 }
 0x1e4   : > { %v792_v62 = vadd.f32 %v1693_v60, %v2575_v24  ;;  %v1112_v63 = vadd.f32 %v1789_v61, %v2575_v24  ;;  %v786_v0 = vpop.f32.mrb[57].mxu0  ;;  %v1106_v1 = vpop.f32.mrb[57].mxu1 }
 0x1e5   : > { %v787_v2 = vadd.f32 %v2575_v24, %v786_v0  ;;  %v1107_v3 = vadd.f32 %v2575_v24, %v1106_v1 }
 0x1e6   : > { %1202 = vst [vmem:[%s2583_s12 + $0x1c8] sm:$0xff] %v792_v62  ;;  %1266 = vst [vmem:[%s2583_s12 + $0x3c8] sm:$0xff] %v1112_v63 }
 0x1e7   : > { %1201 = vst [vmem:[%s2583_s12 + $0x1c0] sm:$0xff] %v787_v2  ;;  %1265 = vst [vmem:[%s2583_s12 + $0x3c0] sm:$0xff] %v1107_v3  ;;  %v1696_v4 = vpop.f32.mrb[58].mxu0  ;;  %v1792_v5 = vpop.f32.mrb[58].mxu1 }
 0x1e8   : > { %v802_v6 = vadd.f32 %v1696_v4, %v2575_v24  ;;  %v1122_v7 = vadd.f32 %v1792_v5, %v2575_v24  ;;  %v796_v8 = vpop.f32.mrb[59].mxu0  ;;  %v1116_v9 = vpop.f32.mrb[59].mxu1 }
 0x1e9   : > { %v797_v10 = vadd.f32 %v2575_v24, %v796_v8  ;;  %v1117_v11 = vadd.f32 %v2575_v24, %v1116_v9 }
 0x1ea   : > { %1204 = vst [vmem:[%s2583_s12 + $0x1d8] sm:$0xff] %v802_v6  ;;  %1268 = vst [vmem:[%s2583_s12 + $0x3d8] sm:$0xff] %v1122_v7 }
 0x1eb   : > { %1203 = vst [vmem:[%s2583_s12 + $0x1d0] sm:$0xff] %v797_v10  ;;  %1267 = vst [vmem:[%s2583_s12 + $0x3d0] sm:$0xff] %v1117_v11  ;;  %v1699_v12 = vpop.f32.mrb[60].mxu0  ;;  %v1795_v13 = vpop.f32.mrb[60].mxu1 }
 0x1ec   : > { %v812_v14 = vadd.f32 %v1699_v12, %v2575_v24  ;;  %v1132_v15 = vadd.f32 %v1795_v13, %v2575_v24  ;;  %v806_v16 = vpop.f32.mrb[61].mxu0  ;;  %v1126_v17 = vpop.f32.mrb[61].mxu1 }
 0x1ed   : > { %v807_v18 = vadd.f32 %v2575_v24, %v806_v16  ;;  %v1127_v19 = vadd.f32 %v2575_v24, %v1126_v17 }
 0x1ee   : > { %1206 = vst [vmem:[%s2583_s12 + $0x1e8] sm:$0xff] %v812_v14  ;;  %1270 = vst [vmem:[%s2583_s12 + $0x3e8] sm:$0xff] %v1132_v15 }
 0x1ef   : > { %1205 = vst [vmem:[%s2583_s12 + $0x1e0] sm:$0xff] %v807_v18  ;;  %1269 = vst [vmem:[%s2583_s12 + $0x3e0] sm:$0xff] %v1127_v19  ;;  %v1702_v20 = vpop.f32.mrb[62].mxu0  ;;  %v1798_v21 = vpop.f32.mrb[62].mxu1 }
 0x1f0   : > { %v822_v22 = vadd.f32 %v1702_v20, %v2575_v24  ;;  %v1142_v23 = vadd.f32 %v1798_v21, %v2575_v24  ;;  %v816_v25 = vpop.f32.mrb[63].mxu0  ;;  %v1136_v26 = vpop.f32.mrb[63].mxu1 }
 0x1f1   : > { %v817_v27 = vadd.f32 %v2575_v24, %v816_v25  ;;  %v1137_v28 = vadd.f32 %v2575_v24, %v1136_v26 }
 0x1f2   : > { %1208 = vst [vmem:[%s2583_s12 + $0x1f8] sm:$0xff] %v822_v22  ;;  %1272 = vst [vmem:[%s2583_s12 + $0x3f8] sm:$0xff] %v1142_v23 }
 0x1f3   : > { %1207 = vst [vmem:[%s2583_s12 + $0x1f0] sm:$0xff] %v817_v27  ;;  %1271 = vst [vmem:[%s2583_s12 + $0x3f0] sm:$0xff] %v1137_v28 }
 0x1f4   : > { %2030 = shalt.err (!%p2027_p12)
}
 0x1f5   : > { %s2031_s8 = scalar_lea.hbm %s2836_s10, 16384  ;;  %s2035_s7 = scalar_lea.hbm %s2906_s4, 32768 }
 0x1f6   : > { %p2032_p4 = scmp.ne.s32.totalorder %s2836_s10, %s2031_s8  ;;  %p2036_p3 = scmp.lt.u32.totalorder %s2836_s10, %s2906_s4 }
 0x1f7   : > { %p2037_p1 = scmp.lt.u32.totalorder %s2035_s7, %s2031_s8  ;;  %p2039_p10 = scmp.lt.u32.totalorder %s2031_s8, %s2836_s10 }
 0x1f8   : > { %p2033_p9 = pnand %p2032_p4, %p2938_p2 }
 0x1f9   : > { %p2038_p0 = por %p2037_p1, %p2036_p3 }
 0x1fa   : > { %p2034_p13 = pneg %p2033_p9 }
 0x1fb   : > { %p2040_p6 = por %p2039_p10, %p2038_p0 }
 0x1fd   : > { %p2041_p11 = pnand %p2040_p6, %p2034_p13 }
 0x1ff   : > { %2044 = shalt.err (!%p2041_p11)
}
 0x200   : > { %s2137_s12 = smov 128   ;;  %s2138_s20 = smov 8  }
 0x201   : > { %1853 = dma.vmem_to_hbm [thread:$0]  (%p2938_p2), %s2838_s21, 16384, %s2836_s10, %s1274_s22, %s2137_s12, %s2137_s12, %s2138_s20  }
 0x202 PF: > { %s1303_s30 = sand.u32 1, %s2109_s28   ;;  %p2939_p7 = scmp.ne.s32.totalorder %s2923_s19, 0 }
 0x203   : > { %p2940_p5 = scmp.ge.s32.totalorder %s2129_s6, 2  ;;  %s1304_s5 = scalar_lea.sflag [#allocation6], %s1303_s30 }
 0x205   : > { %p1865_p8 = pnand %p2940_p5, %p2939_p7 }
 0x207   : > { %2092 = dma.done.wait (!%p1865_p8), %s1304_s5, 16384  }
 0x208   : > { %2094 = vsyncadd (!%p1865_p8), %s1304_s5, 4294950912  ;;  %s27_s6 = sadd.s32 1, %s2129_s6   ;;  %s2941_s30 = sld [smem:[#allocation16_spill]] }
 0x209   : > { %p24_p12 = scmp.ge.s32.totalorder %s27_s6, 4   ;;  %s2942_s5 = sld [smem:[#allocation17_spill]] }
 0x20a   : > { %s2943_s25 = smov %s2101_s26  ;;  %s2944_s26 = smov %s2105_s27 }
 0x20b   : > { %s2945_s27 = smov %s2346_s13  ;;  %s2946_s28 = smov %s2113_s29 }
 0x20c   : > { %s2947_s29 = smov %s2117_s0  ;;  %s2948_s0 = smov %s2263_s17 }
 0x20d   :  { %26 = sbr.rel (!%p24_p12) target bundleno = 22 (0x16), region = 93 }
 0x214   :  { %1309 = vsyncpa [#allocation5], 1 }
 0x215   :  { %1311 = vsyncpa [#allocation5 + $0x1], 1 }
 0x216   :  { %1312 = vsyncpa [#allocation8], 1 }
 0x217   :  { %1314 = vsyncpa [#allocation8 + $0x1], 1 }
 0x218   :  { %1315 = vsyncpa [#allocation6], 1 }
 0x219   :  { %1317 = vsyncpa [#allocation6 + $0x1], 1 }

</bundles_post_ra>
